<compile_context>
chip_gen: v7x
topology: tpu7x:2x2x1
jax: 0.10.0
libtpu: 0.0.40
codegen_flags: <defaults>
</compile_context>

<pallas_src>
import jax
import jax.numpy as jnp
from jax.experimental import pallas as pl
from jax.experimental.pallas import tpu as pltpu


# ----------------------------- logical dims -----------------------------
IN_DIM = 28 * 28      # 784
HID = 200
Z_DIM = 16

# ----------------------------- padded (lane-aligned) dims ---------------
HID_P = 256           # hidden padded to 2 * 128 lanes
Z_P = 128             # z padded to one vreg lane width (weights zero-padded)
MV_P = 2 * Z_P        # fused [mean | var] projection width

MAX_TILE_B = 512      # batch-tile upper bound (amortizes per-step pipeline overhead)


def _round_up(x, m):
    return (x + m - 1) // m * m


def _softplus(x):
    # numerically-stable softplus using only exp/log (matches F.softplus closely)
    return jnp.maximum(x, 0.0) + jnp.log(1.0 + jnp.exp(-jnp.abs(x)))


# ----------------------------- kernel -----------------------------------
def vae_kernel(x_ref, eps_ref,
               w1_ref, b1_ref, w2_ref, b2_ref,
               wmv_ref, bmv_ref,
               wd1_ref, bd1_ref, wd2_ref, bd2_ref, wd3_ref, bd3_ref,
               xrec_ref, z_ref):
    # x arrives at its logical 784-lane width (f32); cast to bf16 in VMEM so the
    # wrapper never materializes a padded bf16 copy of x in HBM.
    xb = x_ref[...].astype(jnp.bfloat16)                       # (TB, 784)

    # ---------------- encoder ----------------
    h1 = jnp.dot(xb, w1_ref[...], preferred_element_type=jnp.float32) + b1_ref[...]
    h1 = jnp.maximum(h1, 0.0).astype(jnp.bfloat16)
    h2 = jnp.dot(h1, w2_ref[...], preferred_element_type=jnp.float32) + b2_ref[...]
    h2 = jnp.maximum(h2, 0.0).astype(jnp.bfloat16)

    # fused [mean | var] projection: one (HID_P, 256) matmul, split at a clean
    # 128-lane vreg boundary (no cross-lane shuffle).
    mv = jnp.dot(h2, wmv_ref[...], preferred_element_type=jnp.float32) + bmv_ref[...]
    mean = mv[:, :Z_P]                                         # (TB, 128) f32
    var = _softplus(mv[:, Z_P:])                               # (TB, 128) f32

    # ---------------- sample z ----------------
    # eps is zero in lanes >= Z_DIM, so padded z lanes are exactly 0; and the
    # padded rows of Wd1 are zero anyway, so they cannot leak into the decoder.
    z = mean + jnp.sqrt(var) * eps_ref[...]                    # (TB, 128) f32
    z_ref[...] = z[:, :Z_DIM]                                  # only the logical lanes

    # ---------------- decoder ----------------
    zb = z.astype(jnp.bfloat16)
    d1 = jnp.dot(zb, wd1_ref[...], preferred_element_type=jnp.float32) + bd1_ref[...]
    d1 = jnp.maximum(d1, 0.0).astype(jnp.bfloat16)
    d2 = jnp.dot(d1, wd2_ref[...], preferred_element_type=jnp.float32) + bd2_ref[...]
    d2 = jnp.maximum(d2, 0.0).astype(jnp.bfloat16)
    logits = jnp.dot(d2, wd3_ref[...], preferred_element_type=jnp.float32) + bd3_ref[...]
    # sigmoid via exp (EUP) + approximate reciprocal (EUP); clamp so the result
    # stays in [0, 1] despite the ~2^-12 reciprocal error (safe for a BCE loss).
    xr = pl.reciprocal(1.0 + jnp.exp(-logits), approx=True)
    xrec_ref[...] = jnp.clip(xr, 0.0, 1.0).astype(xrec_ref.dtype)


# ----------------------------- wrapper -----------------------------------
@jax.jit
def vae_forward(x, eps, packed):
    """x: (B, 784) f32, eps: (B, Z_DIM) f32, packed: padded bf16/f32 params.

    Returns (x_recon, z). x_recon is bf16 on purpose (largest HBM stream; sigmoid
    outputs in [0, 1] tolerate bf16) — cast to f32 downstream only if required.
    """
    B = x.shape[0]
    # Batch tile: big tiles amortize the ~0.35us/step pipeline overhead, but keep
    # at least 2 grid steps so both v7x TensorCores get work on mid-size batches.
    tile_b = min(MAX_TILE_B, max(8, _round_up(pl.cdiv(B, 2), 8)))
    Bp = _round_up(B, tile_b)
    grid = (Bp // tile_b,)

    (w1, b1, w2, b2, wmv, bmv, wd1, bd1, wd2, bd2, wd3, bd3) = packed

    # x is fed at its logical (B, 784) f32 shape — no padded/cast HBM copy in the
    # wrapper; batch rows are only padded when the tile does not divide B.
    x_in = x if Bp == B else jnp.zeros((Bp, IN_DIM), x.dtype).at[:B].set(x)
    # eps is tiny (Z_P * 4 = 512 B/row); pad it with zeros to the 128-lane z slab
    # so padded z lanes stay exactly 0 inside the kernel.
    epsp = jnp.zeros((Bp, Z_P), jnp.float32).at[:B, :Z_DIM].set(eps)

    row_spec = lambda feat: pl.BlockSpec((tile_b, feat), lambda i: (i, 0))
    # Weights/biases: whole array resident in VMEM, no per-grid-step double-buffer.
    w_spec = pl.BlockSpec(memory_space=pltpu.MemorySpace.VMEM)

    in_specs = [row_spec(IN_DIM), row_spec(Z_P)] + [w_spec] * 12
    out_specs = (
        row_spec(IN_DIM),        # x_recon, logical width, bf16
        row_spec(Z_DIM),         # z, logical width, f32
    )
    out_shape = (
        jax.ShapeDtypeStruct((Bp, IN_DIM), jnp.bfloat16),
        jax.ShapeDtypeStruct((Bp, Z_DIM), jnp.float32),
    )

    # advisory cost estimate for the XLA scheduler
    flops = 2 * Bp * (IN_DIM * HID_P + HID_P * HID_P + HID_P * MV_P
                      + Z_P * HID_P + HID_P * HID_P + HID_P * IN_DIM)
    weight_bytes = sum(int(p.size) * p.dtype.itemsize for p in packed)
    bytes_accessed = weight_bytes + Bp * (IN_DIM * 4 + Z_P * 4 + IN_DIM * 2 + Z_DIM * 4)
    transcendentals = Bp * (3 * Z_P + 2 * IN_DIM)

    xrec_p, z_p = pl.pallas_call(
        vae_kernel,
        grid=grid,
        in_specs=in_specs,
        out_specs=out_specs,
        out_shape=out_shape,
        compiler_params=pltpu.CompilerParams(
            dimension_semantics=("parallel",),
            # explicit scoped-VMEM cap: comfortably holds 512-row double-buffered
            # activations + ~1.3 MiB of resident weights on v5e/v6e/v7x.
            vmem_limit_bytes=48 * 1024 * 1024),
        cost_estimate=pl.CostEstimate(
            flops=int(flops),
            transcendentals=int(transcendentals),
            bytes_accessed=int(bytes_accessed)),
    )(x_in, epsp, w1, b1, w2, b2, wmv, bmv, wd1, bd1, wd2, bd2, wd3, bd3)

    if Bp != B:
        xrec_p = xrec_p[:B]
        z_p = z_p[:B]
    return xrec_p, z_p


# ----------------------------- params ------------------------------------
def init_params(key):
    """PyTorch-Linear-like uniform(+-1/sqrt(fan_in)) init, logical (unpadded) shapes.

    Weights are stored [in_features, out_features] (transposed vs nn.Linear) so
    the kernel computes y = x @ W + b directly.
    """
    def linear(key, fan_in, fan_out):
        kw, kb = jax.random.split(key)
        bound = 1.0 / jnp.sqrt(fan_in)
        w = jax.random.uniform(kw, (fan_in, fan_out), jnp.float32, -bound, bound)
        b = jax.random.uniform(kb, (1, fan_out), jnp.float32, -bound, bound)
        return w, b

    keys = jax.random.split(key, 7)
    w1, b1 = linear(keys[0], IN_DIM, HID)
    w2, b2 = linear(keys[1], HID, HID)
    wm, bm = linear(keys[2], HID, Z_DIM)
    wv, bv = linear(keys[3], HID, Z_DIM)
    wd1, bd1 = linear(keys[4], Z_DIM, HID)
    wd2, bd2 = linear(keys[5], HID, HID)
    wd3, bd3 = linear(keys[6], HID, IN_DIM)
    return (w1, b1, w2, b2, wm, bm, wv, bv, wd1, bd1, wd2, bd2, wd3, bd3)


def pack_params(params):
    """Zero-pad to lane-aligned shapes, fuse mean|var, cast weights to bf16."""
    (w1, b1, w2, b2, wm, bm, wv, bv, wd1, bd1, wd2, bd2, wd3, bd3) = params

    def pad_w(w, rows, cols):
        out = jnp.zeros((rows, cols), jnp.float32)
        out = out.at[:w.shape[0], :w.shape[1]].set(w)
        return out.astype(jnp.bfloat16)

    def pad_b(b, cols):
        out = jnp.zeros((1, cols), jnp.float32)
        return out.at[:, :b.shape[1]].set(b)

    # fused [mean | var] projection; mean occupies lanes [0,128), var [128,256)
    wmv = jnp.zeros((HID_P, MV_P), jnp.float32)
    wmv = wmv.at[:HID, :Z_DIM].set(wm).at[:HID, Z_P:Z_P + Z_DIM].set(wv)
    wmv = wmv.astype(jnp.bfloat16)
    bmv = jnp.zeros((1, MV_P), jnp.float32)
    bmv = bmv.at[:, :Z_DIM].set(bm).at[:, Z_P:Z_P + Z_DIM].set(bv)

    return (pad_w(w1, IN_DIM, HID_P), pad_b(b1, HID_P),     # 784 -> 256
            pad_w(w2, HID_P, HID_P), pad_b(b2, HID_P),      # 256 -> 256
            wmv, bmv,                                        # 256 -> 256 (mean|var)
            pad_w(wd1, Z_P, HID_P), pad_b(bd1, HID_P),      # 128 -> 256
            pad_w(wd2, HID_P, HID_P), pad_b(bd2, HID_P),    # 256 -> 256
            pad_w(wd3, HID_P, IN_DIM), pad_b(bd3, IN_DIM))  # 256 -> 784


# ----------------------------- reference ---------------------------------
def reference_forward(x, eps, packed):
    """Pure-JAX mirror of the kernel math (same padded bf16 params, f32 accum)."""
    (w1, b1, w2, b2, wmv, bmv, wd1, bd1, wd2, bd2, wd3, bd3) = packed
    B = x.shape[0]
    xb = x.astype(jnp.bfloat16)
    epsp = jnp.zeros((B, Z_P), jnp.float32).at[:, :Z_DIM].set(eps)

    dot = lambda a, b: jnp.dot(a, b, preferred_element_type=jnp.float32)
    h1 = jnp.maximum(dot(xb, w1) + b1, 0.0).astype(jnp.bfloat16)
    h2 = jnp.maximum(dot(h1, w2) + b2, 0.0).astype(jnp.bfloat16)
    mv = dot(h2, wmv) + bmv
    mean = mv[:, :Z_P]
    var = jax.nn.softplus(mv[:, Z_P:])
    z = mean + jnp.sqrt(var) * epsp
    d1 = jnp.maximum(dot(z.astype(jnp.bfloat16), wd1) + bd1, 0.0).astype(jnp.bfloat16)
    d2 = jnp.maximum(dot(d1, wd2) + bd2, 0.0).astype(jnp.bfloat16)
    xrec = jax.nn.sigmoid(dot(d2, wd3) + bd3)
    return xrec, z[:, :Z_DIM]


# ----------------------------- demo / check ------------------------------
if __name__ == "__main__":
    key = jax.random.PRNGKey(0)
    k_params, k_x, k_eps = jax.random.split(key, 3)

    B = 32  # small demo batch; large batches tile at up to 512 rows / grid step
    params = init_params(k_params)
    packed = pack_params(params)

    # MNIST-like input: values in [0, 1], flattened to 784 features
    x = jax.random.uniform(k_x, (B, IN_DIM), jnp.float32)
    # TODO(synk): torch.randn inside _sample_z is host-side RNG; eps is an explicit
    # input here (same reparameterization math, different RNG stream than torch).
    eps = jax.random.normal(k_eps, (B, Z_DIM), jnp.float32)

    x_recon, z = vae_forward(x, eps, packed)
    jax.block_until_ready((x_recon, z))

    xr_ref, z_ref = reference_forward(x, eps, packed)
    assert x_recon.shape == (B, IN_DIM) and z.shape == (B, Z_DIM)
    assert jnp.allclose(x_recon.astype(jnp.float32), xr_ref.astype(jnp.float32),
                        atol=2e-2, rtol=2e-2)
    assert jnp.allclose(z, z_ref, atol=2e-2, rtol=2e-2)

    print("KERNEL_OK")
</pallas_src>

<mosaic_0001>
module attributes {stable_mosaic.version = 11 : i64} {
  func.func @vae_kernel(%arg0: i32, %arg1: memref<16x784xf32, #tpu.memory_space<vmem>>, %arg2: memref<16x128xf32, #tpu.memory_space<vmem>>, %arg3: memref<784x256xbf16, #tpu.memory_space<vmem>>, %arg4: memref<1x256xf32, #tpu.memory_space<vmem>>, %arg5: memref<256x256xbf16, #tpu.memory_space<vmem>>, %arg6: memref<1x256xf32, #tpu.memory_space<vmem>>, %arg7: memref<256x256xbf16, #tpu.memory_space<vmem>>, %arg8: memref<1x256xf32, #tpu.memory_space<vmem>>, %arg9: memref<128x256xbf16, #tpu.memory_space<vmem>>, %arg10: memref<1x256xf32, #tpu.memory_space<vmem>>, %arg11: memref<256x256xbf16, #tpu.memory_space<vmem>>, %arg12: memref<1x256xf32, #tpu.memory_space<vmem>>, %arg13: memref<256x784xbf16, #tpu.memory_space<vmem>>, %arg14: memref<1x784xf32, #tpu.memory_space<vmem>>, %arg15: memref<16x784xbf16, #tpu.memory_space<vmem>>, %arg16: memref<16x16xf32, #tpu.memory_space<vmem>>) attributes {dimension_semantics = [#tpu.dimension_semantics<parallel>], iteration_bounds = array<i64: 2>, scalar_prefetch = 0 : i64, scratch_operands = 0 : i64, tpu.core_type = #tpu.core_type<tc>, window_params = [{transform_indices = @transform_0, window_bounds = array<i64: 16, 784>}, {transform_indices = @transform_1, window_bounds = array<i64: 16, 128>}, {pipeline_mode = #tpu.pipeline_mode<synchronous>, transform_indices = @transform_2, window_bounds = array<i64: 784, 256>}, {pipeline_mode = #tpu.pipeline_mode<synchronous>, transform_indices = @transform_3, window_bounds = array<i64: 1, 256>}, {pipeline_mode = #tpu.pipeline_mode<synchronous>, transform_indices = @transform_4, window_bounds = array<i64: 256, 256>}, {pipeline_mode = #tpu.pipeline_mode<synchronous>, transform_indices = @transform_5, window_bounds = array<i64: 1, 256>}, {pipeline_mode = #tpu.pipeline_mode<synchronous>, transform_indices = @transform_6, window_bounds = array<i64: 256, 256>}, {pipeline_mode = #tpu.pipeline_mode<synchronous>, transform_indices = @transform_7, window_bounds = array<i64: 1, 256>}, {pipeline_mode = #tpu.pipeline_mode<synchronous>, transform_indices = @transform_8, window_bounds = array<i64: 128, 256>}, {pipeline_mode = #tpu.pipeline_mode<synchronous>, transform_indices = @transform_9, window_bounds = array<i64: 1, 256>}, {pipeline_mode = #tpu.pipeline_mode<synchronous>, transform_indices = @transform_10, window_bounds = array<i64: 256, 256>}, {pipeline_mode = #tpu.pipeline_mode<synchronous>, transform_indices = @transform_11, window_bounds = array<i64: 1, 256>}, {pipeline_mode = #tpu.pipeline_mode<synchronous>, transform_indices = @transform_12, window_bounds = array<i64: 256, 784>}, {pipeline_mode = #tpu.pipeline_mode<synchronous>, transform_indices = @transform_13, window_bounds = array<i64: 1, 784>}, {transform_indices = @transform_14, window_bounds = array<i64: 16, 784>}, {transform_indices = @transform_15, window_bounds = array<i64: 16, 16>}]} {
    %c0 = arith.constant 0 : index
    %c0_0 = arith.constant 0 : index
    %0 = vector.load %arg1[%c0, %c0_0] : memref<16x784xf32, #tpu.memory_space<vmem>>, vector<16x784xf32>
    %1 = arith.truncf %0 : vector<16x784xf32> to vector<16x784xbf16>
    %c0_1 = arith.constant 0 : index
    %c0_2 = arith.constant 0 : index
    %2 = vector.load %arg3[%c0_1, %c0_2] : memref<784x256xbf16, #tpu.memory_space<vmem>>, vector<784x256xbf16>
    %cst = arith.constant dense<0.000000e+00> : vector<16x256xf32>
    %3 = tpu.matmul %1, %2, %cst {dimension_numbers = #tpu.dot_dimension_numbers<[1], [0], [0], [1], [0, 0, 1, 1], [], []>} : vector<16x784xbf16>, vector<784x256xbf16>, vector<16x256xf32> -> vector<16x256xf32>
    %c0_3 = arith.constant 0 : index
    %c0_4 = arith.constant 0 : index
    %4 = vector.load %arg4[%c0_3, %c0_4] : memref<1x256xf32, #tpu.memory_space<vmem>>, vector<1x256xf32>
    %5 = vector.broadcast %4 : vector<1x256xf32> to vector<16x256xf32>
    %6 = arith.addf %3, %5 : vector<16x256xf32>
    %cst_5 = arith.constant 0.000000e+00 : f32
    %7 = vector.broadcast %cst_5 : f32 to vector<16x256xf32>
    %8 = arith.maximumf %6, %7 : vector<16x256xf32>
    %9 = arith.truncf %8 : vector<16x256xf32> to vector<16x256xbf16>
    %c0_6 = arith.constant 0 : index
    %c0_7 = arith.constant 0 : index
    %10 = vector.load %arg5[%c0_6, %c0_7] : memref<256x256xbf16, #tpu.memory_space<vmem>>, vector<256x256xbf16>
    %cst_8 = arith.constant dense<0.000000e+00> : vector<16x256xf32>
    %11 = tpu.matmul %9, %10, %cst_8 {dimension_numbers = #tpu.dot_dimension_numbers<[1], [0], [0], [1], [0, 0, 1, 1], [], []>} : vector<16x256xbf16>, vector<256x256xbf16>, vector<16x256xf32> -> vector<16x256xf32>
    %c0_9 = arith.constant 0 : index
    %c0_10 = arith.constant 0 : index
    %12 = vector.load %arg6[%c0_9, %c0_10] : memref<1x256xf32, #tpu.memory_space<vmem>>, vector<1x256xf32>
    %13 = vector.broadcast %12 : vector<1x256xf32> to vector<16x256xf32>
    %14 = arith.addf %11, %13 : vector<16x256xf32>
    %cst_11 = arith.constant 0.000000e+00 : f32
    %15 = vector.broadcast %cst_11 : f32 to vector<16x256xf32>
    %16 = arith.maximumf %14, %15 : vector<16x256xf32>
    %17 = arith.truncf %16 : vector<16x256xf32> to vector<16x256xbf16>
    %c0_12 = arith.constant 0 : index
    %c0_13 = arith.constant 0 : index
    %18 = vector.load %arg7[%c0_12, %c0_13] : memref<256x256xbf16, #tpu.memory_space<vmem>>, vector<256x256xbf16>
    %cst_14 = arith.constant dense<0.000000e+00> : vector<16x256xf32>
    %19 = tpu.matmul %17, %18, %cst_14 {dimension_numbers = #tpu.dot_dimension_numbers<[1], [0], [0], [1], [0, 0, 1, 1], [], []>} : vector<16x256xbf16>, vector<256x256xbf16>, vector<16x256xf32> -> vector<16x256xf32>
    %c0_15 = arith.constant 0 : index
    %c0_16 = arith.constant 0 : index
    %20 = vector.load %arg8[%c0_15, %c0_16] : memref<1x256xf32, #tpu.memory_space<vmem>>, vector<1x256xf32>
    %21 = vector.broadcast %20 : vector<1x256xf32> to vector<16x256xf32>
    %22 = arith.addf %19, %21 : vector<16x256xf32>
    %23 = vector.extract_strided_slice %22 {offsets = [0, 0], sizes = [16, 128], strides = [1, 1]} : vector<16x256xf32> to vector<16x128xf32>
    %24 = vector.extract_strided_slice %22 {offsets = [0, 128], sizes = [16, 128], strides = [1, 1]} : vector<16x256xf32> to vector<16x128xf32>
    %cst_17 = arith.constant 0.000000e+00 : f32
    %25 = vector.broadcast %cst_17 : f32 to vector<16x128xf32>
    %26 = arith.maximumf %24, %25 : vector<16x128xf32>
    %27 = math.absf %24 : vector<16x128xf32>
    %cst_18 = arith.constant 0.000000e+00 : f32
    %28 = vector.broadcast %cst_18 : f32 to vector<16x128xf32>
    %29 = arith.subf %28, %27 : vector<16x128xf32>
    %30 = math.exp %29 : vector<16x128xf32>
    %cst_19 = arith.constant 1.000000e+00 : f32
    %31 = vector.broadcast %cst_19 : f32 to vector<16x128xf32>
    %32 = arith.addf %31, %30 : vector<16x128xf32>
    %33 = math.log %32 : vector<16x128xf32>
    %34 = arith.addf %26, %33 : vector<16x128xf32>
    %35 = math.sqrt %34 : vector<16x128xf32>
    %c0_20 = arith.constant 0 : index
    %c0_21 = arith.constant 0 : index
    %36 = vector.load %arg2[%c0_20, %c0_21] : memref<16x128xf32, #tpu.memory_space<vmem>>, vector<16x128xf32>
    %37 = arith.mulf %35, %36 : vector<16x128xf32>
    %38 = arith.addf %23, %37 : vector<16x128xf32>
    %39 = vector.extract_strided_slice %38 {offsets = [0, 0], sizes = [16, 16], strides = [1, 1]} : vector<16x128xf32> to vector<16x16xf32>
    %c0_22 = arith.constant 0 : index
    %c0_23 = arith.constant 0 : index
    %40 = vector.load %arg16[%c0_22, %c0_23] : memref<16x16xf32, #tpu.memory_space<vmem>>, vector<16x16xf32>
    tpu.vector_store %arg16[%c0_22, %c0_23], %39 {strides = array<i32>} : memref<16x16xf32, #tpu.memory_space<vmem>>, vector<16x16xf32>,
    %41 = arith.truncf %38 : vector<16x128xf32> to vector<16x128xbf16>
    %c0_24 = arith.constant 0 : index
    %c0_25 = arith.constant 0 : index
    %42 = vector.load %arg9[%c0_24, %c0_25] : memref<128x256xbf16, #tpu.memory_space<vmem>>, vector<128x256xbf16>
    %cst_26 = arith.constant dense<0.000000e+00> : vector<16x256xf32>
    %43 = tpu.matmul %41, %42, %cst_26 {dimension_numbers = #tpu.dot_dimension_numbers<[1], [0], [0], [1], [0, 0, 1, 1], [], []>} : vector<16x128xbf16>, vector<128x256xbf16>, vector<16x256xf32> -> vector<16x256xf32>
    %c0_27 = arith.constant 0 : index
    %c0_28 = arith.constant 0 : index
    %44 = vector.load %arg10[%c0_27, %c0_28] : memref<1x256xf32, #tpu.memory_space<vmem>>, vector<1x256xf32>
    %45 = vector.broadcast %44 : vector<1x256xf32> to vector<16x256xf32>
    %46 = arith.addf %43, %45 : vector<16x256xf32>
    %cst_29 = arith.constant 0.000000e+00 : f32
    %47 = vector.broadcast %cst_29 : f32 to vector<16x256xf32>
    %48 = arith.maximumf %46, %47 : vector<16x256xf32>
    %49 = arith.truncf %48 : vector<16x256xf32> to vector<16x256xbf16>
    %c0_30 = arith.constant 0 : index
    %c0_31 = arith.constant 0 : index
    %50 = vector.load %arg11[%c0_30, %c0_31] : memref<256x256xbf16, #tpu.memory_space<vmem>>, vector<256x256xbf16>
    %cst_32 = arith.constant dense<0.000000e+00> : vector<16x256xf32>
    %51 = tpu.matmul %49, %50, %cst_32 {dimension_numbers = #tpu.dot_dimension_numbers<[1], [0], [0], [1], [0, 0, 1, 1], [], []>} : vector<16x256xbf16>, vector<256x256xbf16>, vector<16x256xf32> -> vector<16x256xf32>
    %c0_33 = arith.constant 0 : index
    %c0_34 = arith.constant 0 : index
    %52 = vector.load %arg12[%c0_33, %c0_34] : memref<1x256xf32, #tpu.memory_space<vmem>>, vector<1x256xf32>
    %53 = vector.broadcast %52 : vector<1x256xf32> to vector<16x256xf32>
    %54 = arith.addf %51, %53 : vector<16x256xf32>
    %cst_35 = arith.constant 0.000000e+00 : f32
    %55 = vector.broadcast %cst_35 : f32 to vector<16x256xf32>
    %56 = arith.maximumf %54, %55 : vector<16x256xf32>
    %57 = arith.truncf %56 : vector<16x256xf32> to vector<16x256xbf16>
    %c0_36 = arith.constant 0 : index
    %c0_37 = arith.constant 0 : index
    %58 = vector.load %arg13[%c0_36, %c0_37] : memref<256x784xbf16, #tpu.memory_space<vmem>>, vector<256x784xbf16>
    %cst_38 = arith.constant dense<0.000000e+00> : vector<16x784xf32>
    %59 = tpu.matmul %57, %58, %cst_38 {dimension_numbers = #tpu.dot_dimension_numbers<[1], [0], [0], [1], [0, 0, 1, 1], [], []>} : vector<16x256xbf16>, vector<256x784xbf16>, vector<16x784xf32> -> vector<16x784xf32>
    %c0_39 = arith.constant 0 : index
    %c0_40 = arith.constant 0 : index
    %60 = vector.load %arg14[%c0_39, %c0_40] : memref<1x784xf32, #tpu.memory_space<vmem>>, vector<1x784xf32>
    %61 = vector.broadcast %60 : vector<1x784xf32> to vector<16x784xf32>
    %62 = arith.addf %59, %61 : vector<16x784xf32>
    %cst_41 = arith.constant 0.000000e+00 : f32
    %63 = vector.broadcast %cst_41 : f32 to vector<16x784xf32>
    %64 = arith.subf %63, %62 : vector<16x784xf32>
    %65 = math.exp %64 : vector<16x784xf32>
    %cst_42 = arith.constant 1.000000e+00 : f32
    %66 = vector.broadcast %cst_42 : f32 to vector<16x784xf32>
    %67 = arith.addf %66, %65 : vector<16x784xf32>
    %68 = tpu.reciprocal %67 {approx = true} : vector<16x784xf32> -> vector<16x784xf32>
    %cst_43 = arith.constant 0.000000e+00 : f32
    %cst_44 = arith.constant 1.000000e+00 : f32
    %69 = vector.broadcast %cst_43 : f32 to vector<16x784xf32>
    %70 = arith.maximumf %69, %68 : vector<16x784xf32>
    %71 = vector.broadcast %cst_44 : f32 to vector<16x784xf32>
    %72 = arith.minimumf %71, %70 : vector<16x784xf32>
    %73 = arith.truncf %72 : vector<16x784xf32> to vector<16x784xbf16>
    %c0_45 = arith.constant 0 : index
    %c0_46 = arith.constant 0 : index
    %74 = vector.load %arg15[%c0_45, %c0_46] : memref<16x784xbf16, #tpu.memory_space<vmem>>, vector<16x784xbf16>
    tpu.vector_store %arg15[%c0_45, %c0_46], %73 {strides = array<i32>} : memref<16x784xbf16, #tpu.memory_space<vmem>>, vector<16x784xbf16>,
    return
  }
  func.func @transform_0(%arg0: i32) -> (i32, i32) {
    %c0_i32 = arith.constant 0 : i32
    %c0_i32_0 = arith.constant 0 : i32
    return %arg0, %c0_i32 : i32, i32
  }
  func.func @transform_1(%arg0: i32) -> (i32, i32) {
    %c0_i32 = arith.constant 0 : i32
    %c0_i32_0 = arith.constant 0 : i32
    return %arg0, %c0_i32 : i32, i32
  }
  func.func @transform_2(%arg0: i32) -> (i32, i32) {
    %c0_i32 = arith.constant 0 : i32
    %c0_i32_0 = arith.constant 0 : i32
    %c0_i32_1 = arith.constant 0 : i32
    return %c0_i32, %c0_i32_0 : i32, i32
  }
  func.func @transform_3(%arg0: i32) -> (i32, i32) {
    %c0_i32 = arith.constant 0 : i32
    %c0_i32_0 = arith.constant 0 : i32
    %c0_i32_1 = arith.constant 0 : i32
    return %c0_i32, %c0_i32_0 : i32, i32
  }
  func.func @transform_4(%arg0: i32) -> (i32, i32) {
    %c0_i32 = arith.constant 0 : i32
    %c0_i32_0 = arith.constant 0 : i32
    %c0_i32_1 = arith.constant 0 : i32
    return %c0_i32, %c0_i32_0 : i32, i32
  }
  func.func @transform_5(%arg0: i32) -> (i32, i32) {
    %c0_i32 = arith.constant 0 : i32
    %c0_i32_0 = arith.constant 0 : i32
    %c0_i32_1 = arith.constant 0 : i32
    return %c0_i32, %c0_i32_0 : i32, i32
  }
  func.func @transform_6(%arg0: i32) -> (i32, i32) {
    %c0_i32 = arith.constant 0 : i32
    %c0_i32_0 = arith.constant 0 : i32
    %c0_i32_1 = arith.constant 0 : i32
    return %c0_i32, %c0_i32_0 : i32, i32
  }
  func.func @transform_7(%arg0: i32) -> (i32, i32) {
    %c0_i32 = arith.constant 0 : i32
    %c0_i32_0 = arith.constant 0 : i32
    %c0_i32_1 = arith.constant 0 : i32
    return %c0_i32, %c0_i32_0 : i32, i32
  }
  func.func @transform_8(%arg0: i32) -> (i32, i32) {
    %c0_i32 = arith.constant 0 : i32
    %c0_i32_0 = arith.constant 0 : i32
    %c0_i32_1 = arith.constant 0 : i32
    return %c0_i32, %c0_i32_0 : i32, i32
  }
  func.func @transform_9(%arg0: i32) -> (i32, i32) {
    %c0_i32 = arith.constant 0 : i32
    %c0_i32_0 = arith.constant 0 : i32
    %c0_i32_1 = arith.constant 0 : i32
    return %c0_i32, %c0_i32_0 : i32, i32
  }
  func.func @transform_10(%arg0: i32) -> (i32, i32) {
    %c0_i32 = arith.constant 0 : i32
    %c0_i32_0 = arith.constant 0 : i32
    %c0_i32_1 = arith.constant 0 : i32
    return %c0_i32, %c0_i32_0 : i32, i32
  }
  func.func @transform_11(%arg0: i32) -> (i32, i32) {
    %c0_i32 = arith.constant 0 : i32
    %c0_i32_0 = arith.constant 0 : i32
    %c0_i32_1 = arith.constant 0 : i32
    return %c0_i32, %c0_i32_0 : i32, i32
  }
  func.func @transform_12(%arg0: i32) -> (i32, i32) {
    %c0_i32 = arith.constant 0 : i32
    %c0_i32_0 = arith.constant 0 : i32
    %c0_i32_1 = arith.constant 0 : i32
    return %c0_i32, %c0_i32_0 : i32, i32
  }
  func.func @transform_13(%arg0: i32) -> (i32, i32) {
    %c0_i32 = arith.constant 0 : i32
    %c0_i32_0 = arith.constant 0 : i32
    %c0_i32_1 = arith.constant 0 : i32
    return %c0_i32, %c0_i32_0 : i32, i32
  }
  func.func @transform_14(%arg0: i32) -> (i32, i32) {
    %c0_i32 = arith.constant 0 : i32
    %c0_i32_0 = arith.constant 0 : i32
    return %arg0, %c0_i32 : i32, i32
  }
  func.func @transform_15(%arg0: i32) -> (i32, i32) {
    %c0_i32 = arith.constant 0 : i32
    %c0_i32_0 = arith.constant 0 : i32
    return %arg0, %c0_i32 : i32, i32
  }
}

</mosaic_0001>

<bundles_post_ra>
// kernel: vae_forward.1
= control target key start
LH: loop header
LB: loop body
LE: loop exit
PB: predicated region body
PF: predicated region fallthrough
CT: control target
= control target key end

     0   :  { %s5841_s0 = inlined_call_operand.vmem [shape: f32[32,784], index: 0, kind: input, shape index: {}]   ;;  %s5842_s1 = inlined_call_operand.vmem [shape: f32[32,128], index: 1, kind: input, shape index: {}]   ;;  %s5843_s2 = inlined_call_operand.vmem [shape: bf16[784,256], index: 2, kind: input, shape index: {}]   ;;  %s5844_s3 = inlined_call_operand.vmem [shape: f32[1,256], index: 3, kind: input, shape index: {}]   ;;  %s5845_s4 = inlined_call_operand.vmem [shape: bf16[256,256], index: 4, kind: input, shape index: {}]   ;;  %s5846_s5 = inlined_call_operand.vmem [shape: f32[1,256], index: 5, kind: input, shape index: {}]   ;;  %s5847_s6 = inlined_call_operand.vmem [shape: bf16[256,256], index: 6, kind: input, shape index: {}]   ;;  %s5848_s7 = inlined_call_operand.vmem [shape: f32[1,256], index: 7, kind: input, shape index: {}]   ;;  %s5849_s8 = inlined_call_operand.hbm [shape: bf16[128,256], index: 8, kind: input, shape index: {}]   ;;  %s5850_s9 = inlined_call_operand.vmem [shape: f32[1,256], index: 9, kind: input, shape index: {}]   ;;  %s5851_s10 = inlined_call_operand.vmem [shape: bf16[256,256], index: 10, kind: input, shape index: {}]   ;;  %s5852_s11 = inlined_call_operand.vmem [shape: f32[1,256], index: 11, kind: input, shape index: {}]   ;;  %s5853_s12 = inlined_call_operand.vmem [shape: bf16[256,784], index: 12, kind: input, shape index: {}]   ;;  %s5854_s13 = inlined_call_operand.vmem [shape: f32[1,784], index: 13, kind: input, shape index: {}]   ;;  %s5855_s14 = inlined_call_operand.hbm [shape: bf16[32,784], index: 14, kind: output, shape index: {0}]   ;;  %s5856_s15 = inlined_call_operand.vmem [shape: f32[32,16], index: 15, kind: output, shape index: {1}]  }
   0x1   :  { %5865 = sst [smem:[#allocation13_spill]] %s5849_s8 }
   0x2   :  { %21 = vsyncpa [#allocation3], 0 }
   0x3   :  { %22 = vsyncpa [#allocation4], 0 }
   0x4   :  { %24 = vsyncpa [#allocation4 + $0x1], 0  ;;  %s4680_s18 = smov 0   ;;  %s4682_s19 = smov 0  }
   0x5   :  { %s4684_s20 = smov 0   ;;  %s4686_s21 = smov 0  }
   0x6 LB: > { %5866 = sst [smem:[#allocation8_spill]] %s4579_s18  ;;  %s4701_s22 = sadd.s32 4294967295, %s4591_s21   ;;  %s4591_s21 = sphi %s4686_s21, %s5883_s21   ;;  %s4587_s20 = sphi %s4684_s20, %s5885_s20   ;;  %s4583_s19 = sphi %s4682_s19, %s5887_s19   ;;  %s4579_s18 = sphi %s4680_s18, %s5886_s18  }
   0x7   : > { %5867 = sst [smem:[#allocation9_spill]] %s4587_s20  ;;  %s3502_s23 = sadd.s32 4294967294, %s4591_s21  }
   0x8   : > { %s4705_s24 = sadd.s32 1, %s4591_s21   ;;  %s341_s25 = sadd.s32 1, %s4587_s20 }
   0x9   : > { %5868 = sst [smem:[#allocation10_spill]] %s4705_s24  ;;  %s338_s26 = ssub.s32 %s4591_s21, %s4705_s24 }
   0xa   : > { %p351_p0 = scmp.ne.s32.totalorder %s4587_s20, %s4583_s19  ;;  %p339_p1 = scmp.eq.s32.totalorder %s338_s26, 0 }
   0xb   : > { %p352_p2 = scmp.eq.s32.totalorder %s4701_s22, 1  ;;  %p357_p3 = scmp.ne.s32.totalorder %s4583_s19, %s4579_s18 }
   0xc   : > { %p358_p4 = scmp.eq.s32.totalorder %s3502_s23, 1  ;;  %p3503_p7 = scmp.ge.s32.totalorder %s4591_s21, 1 }
   0xd   : > { %s4716_s27 = scalar_select %p339_p1, %s4587_s20, %s341_s25  }
   0xe   : > { %p4718_p5 = por %p352_p2, %p351_p0  ;;  %p4722_p6 = por %p358_p4, %p357_p3 }
   0xf   : > { %5869 = sst [smem:[#allocation11_spill]] %s4716_s27  ;;  %p391_p8 = scmp.lt.s32.totalorder %s4591_s21, 3 }
  0x10   : > { %s5870_s28 = scalar_select %p4718_p5, 1, 0 }
  0x11   : > { %s5871_s29 = scalar_select %p4722_p6, 1, 0 }
  0x12   : > { %p5862_p9 = scmp.eq.s32.totalorder %s4701_s22, 0  ;;  %p4729_p10 = pnand %p3503_p7, %p391_p8 }
  0x13   : > { %5872 = sst [smem:[#allocation12_spill]] %s5871_s29  ;;  %s4593_s16 = smov [#allocation2]  }
  0x14   : > { %s5873_s30 = scalar_select %p4729_p10, 1, 0 }
  0x15   : > { %s421_s17 = sshll.u32 %s4593_s16, 4  ;;  %p3905_p11 = pneg %p4729_p10  ;;  %s422_s17 = int_to_ptr.vmem [resolvable:$true] %s421_s17 }
  0x16   : > { %s5875_s8 = sld [smem:[#allocation13_spill]] }
  0x17   : > { %p4737_p12 = pnand %p5862_p9, %p3905_p11 }
  0x19   : > { %p4499_p0 = pneg %p4737_p12 }
  0x1c   : > { %s4497_s27 = scalar_lea.hbm %s5875_s8, 2048 }
  0x1d   : > { %p4498_p13 = scmp.ne.s32.totalorder %s5875_s8, %s4497_s27  ;;  %p4504_p3 = scmp.lt.u32.totalorder %s4497_s27, %s5875_s8 }
  0x1f   : > { %p4500_p1 = pnand %p4499_p0, %p4498_p13 }
  0x21   : > { %p4501_p2 = pneg %p4500_p1 }
  0x23   : > { %p4506_p4 = pnand %p4504_p3, %p4501_p2 }
  0x25   : > { %4509 = shalt.err (!%p4506_p4)
}
  0x26   : > { %s4510_s18 = scalar_lea.vmem %s422_s17, 2048  ;;  %p4518_p9 = scmp.lt.s32.totalorder %s422_s17, %s422_s17 }
  0x27   : > { %p4511_p7 = scmp.ne.s32.totalorder %s422_s17, %s4510_s18  ;;  %p4519_p6 = scmp.lt.s32.totalorder %s4510_s18, %s4510_s18 }
  0x29   : > { %p4513_p8 = pnand %p4511_p7, %p4499_p0  ;;  %p4520_p5 = por %p4519_p6, %p4518_p9 }
  0x2b   : > { %p4514_p11 = pneg %p4513_p8 }
  0x2d   : > { %p4521_p10 = pnand %p4520_p5, %p4514_p11 }
  0x2f   : > { %4524 = shalt.err (!%p4521_p10)
}
  0x30   : > { %s4594_s20 = smov 128   ;;  %s4595_s24 = smov 8  }
  0x31   : > { %3908 = dma.hbm_to_vmem [thread:$0]  (!%p4737_p12), %s5875_s8, 2048, %s422_s17, [#allocation3], %s4594_s20, %s4594_s20, %s4595_s24  }
  0x32   : > { %p5876_p13 = scmp.ne.s32.totalorder %s5873_s30, 0 }
  0x33   : > { %p5877_p1 = scmp.eq.s32.totalorder (!%p5876_p13), %s4701_s22, 0 }
  0x34   : > { %471 = sbr.rel (%p5876_p13) target bundleno = 1745 (0x6d1), region = 76 }
  0x3b   : > { %4570 = dma.done.wait (%p5877_p1), [#allocation3], 2048   ;;  %p5878_p0 = pmov %p5877_p1 }
  0x3c   : > { %v3954_v0 = vld [vmem:[%s5843_s2 + $0x4] ss:$8 sps:$4 sm:$0xff]   ;;  %v3956_v1 = vld [vmem:[%s5843_s2] ss:$8 sps:$4 sm:$0xff]   ;;  %v3957_v2 = vld [vmem:[%s5843_s2 + $0x14] ss:$8 sps:$4 sm:$0xff]  }
  0x3d   : > { %4572 = vsyncadd (%p5878_p0), [#allocation3], 4294965248  ;;  %1176 = vmatprep.subr.bf16.mxu0 %v3954_v0  ;;  %v3959_v3 = vld [vmem:[%s5843_s2 + $0x10] ss:$8 sps:$4 sm:$0xff]   ;;  %s3508_s24 = sshll.u32 %s4701_s22, 1  ;;  %v4596_v44 = vmov 0  }
  0x3e   : > { %1177 = vmatpush1.bf16.msra.mxu0 %v3956_v1  ;;  %v3960_v4 = vld [vmem:[%s5843_s2 + $0x24] ss:$8 sps:$4 sm:$0xff]   ;;  %p531_p5 = scmp.lt.s32.totalorder %s3508_s24, 3  ;;  %v3962_v5 = vld [vmem:[%s5843_s2 + $0x20] ss:$8 sps:$4 sm:$0xff]   ;;  %1337 = vmatprep.mubr.bf16.mxu1 %v4596_v44  ;;  %vm1172_vm0 = vcmask 130048  }
  0x3f   : > { %1178 = vmatprep.subr.bf16.mxu0 %v3957_v2  ;;  %v3963_v6 = vld [vmem:[%s5843_s2 + $0x34] ss:$8 sps:$4 sm:$0xff]   ;;  %v3965_v7 = vld [vmem:[%s5843_s2 + $0x30] ss:$8 sps:$4 sm:$0xff]   ;;  %v3966_v8 = vld [vmem:[%s5843_s2 + $0x44] ss:$8 sps:$4 sm:$0xff]  }
  0x40   : > { %s5889_s24 = smov (!%p531_p5, %s3508_s24), 3  ;;  %v3968_v9 = vld [vmem:[%s5843_s2 + $0x40] ss:$8 sps:$4 sm:$0xff]   ;;  %v3969_v10 = vld [vmem:[%s5843_s2 + $0x54] ss:$8 sps:$4 sm:$0xff]   ;;  %s520_s20 = sand.u32 1, %s4583_s19  }
  0x41   : > { %s3897_s25 = smul.u32 56, %s5889_s24  ;;  %v3971_v11 = vld [vmem:[%s5843_s2 + $0x50] ss:$8 sps:$4 sm:$0xff]   ;;  %v3972_v12 = vld [vmem:[%s5843_s2 + $0x64] ss:$8 sps:$4 sm:$0xff]   ;;  %vm3361_vm5 = vcmask 125952  }
  0x42   : > { %1179 = vmatpush1.bf16.msra.mxu0 %v3959_v3  ;;  %v3974_v16 = vld [vmem:[%s5843_s2 + $0x60] ss:$8 sps:$4 sm:$0xff]   ;;  %v3975_v17 = vld [vmem:[%s5843_s2 + $0x74] ss:$8 sps:$4 sm:$0xff]   ;;  %v3977_v18 = vld [vmem:[%s5843_s2 + $0x70] ss:$8 sps:$4 sm:$0xff]  }
  0x43   : > { %1180 = vmatprep.subr.bf16.mxu0 %v3960_v4  ;;  %s4803_s17 = scalar_lea.vmem %s5841_s0, %s3897_s25  ;;  %v3978_v19 = vld [vmem:[%s5843_s2 + $0x84] ss:$8 sps:$4 sm:$0xff]   ;;  %v3980_v20 = vld [vmem:[%s5843_s2 + $0x80] ss:$8 sps:$4 sm:$0xff]   ;;  %v3981_v21 = vld [vmem:[%s5843_s2 + $0x94] ss:$8 sps:$4 sm:$0xff]  }
  0x44   : > { %v552_v13 = vld [vmem:[%s4803_s17 + $0x8] sm:$0xff]  ;;  %v559_v14 = vld [vmem:[%s4803_s17 + $0x40] sm:$0xff]  ;;  %v3983_v22 = vld [vmem:[%s5843_s2 + $0x90] ss:$8 sps:$4 sm:$0xff]   ;;  %s3898_s18 = smul.u32 896, %s4701_s22  ;;  %s5800_s29 = scalar_lea.sflag [#allocation4], %s520_s20 }
  0x45   : > { %v566_v15 = vpack.c.bf16 %v559_v14, %v552_v13  ;;  %v3984_v23 = vld [vmem:[%s5843_s2 + $0xa4] ss:$8 sps:$4 sm:$0xff]   ;;  %v3986_v24 = vld [vmem:[%s5843_s2 + $0xa0] ss:$8 sps:$4 sm:$0xff]   ;;  %v3987_v25 = vld [vmem:[%s5843_s2 + $0xb4] ss:$8 sps:$4 sm:$0xff]  }
  0x46   : > { %1181 = vmatpush1.bf16.msra.mxu0 %v3962_v5  ;;  %v3989_v26 = vld [vmem:[%s5843_s2 + $0xb0] ss:$8 sps:$4 sm:$0xff]   ;;  %v3990_v27 = vld [vmem:[%s5843_s2 + $0xc4] ss:$8 sps:$4 sm:$0xff]   ;;  %v3992_v28 = vld [vmem:[%s5843_s2 + $0xc0] ss:$8 sps:$4 sm:$0xff]  }
  0x47   : > { %1182 = vmatprep.subr.bf16.mxu0 %v3963_v6  ;;  %1208 = vmatprep.mubr.bf16.mxu0 %v566_v15  ;;  %v3993_v29 = vld [vmem:[%s5843_s2 + $0xd4] ss:$8 sps:$4 sm:$0xff]   ;;  %v3995_v30 = vld [vmem:[%s5843_s2 + $0xd0] ss:$8 sps:$4 sm:$0xff]   ;;  %v3996_v31 = vld [vmem:[%s5843_s2 + $0xe4] ss:$8 sps:$4 sm:$0xff]  }
  0x48   : > { %v3998_v32 = vld [vmem:[%s5843_s2 + $0xe0] ss:$8 sps:$4 sm:$0xff]   ;;  %v3999_v33 = vld [vmem:[%s5843_s2 + $0xf4] ss:$8 sps:$4 sm:$0xff]   ;;  %v4001_v34 = vld [vmem:[%s5843_s2 + $0xf0] ss:$8 sps:$4 sm:$0xff]  }
  0x49   : > { %v4004_v35 = vld [vmem:[%s5843_s2 + $0x104] ss:$8 sps:$4 sm:$0xff]   ;;  %v558_v37 = vld [vmem:[%s4803_s17 + $0x38] sm:$0xff]  ;;  %v561_v39 = vld [vmem:[%s4803_s17 + $0x50] sm:$0xff]  ;;  %p5879_p9 = scmp.ne.s32.totalorder %s5870_s28, 0  ;;  %s4597_s23 = smov [#allocation5]  }
  0x4a   : > { %1183 = vmatpush1.bf16.msra.mxu0 %v3965_v7  ;;  %v551_v36 = vld [vmem:[%s4803_s17] sm:$0xff]  ;;  %v554_v38 = vld [vmem:[%s4803_s17 + $0x18] sm:$0xff]  ;;  %v557_v49 = vld [vmem:[%s4803_s17 + $0x30] sm:$0xff]  ;;  %s4529_s16 = sshll.u32 %s4597_s23, 4  ;;  %s4530_s16 = int_to_ptr.vmem [resolvable:$false] %s4529_s16 }
  0x4b   : > { %1184 = vmatprep.subr.bf16.mxu0 %v3966_v8  ;;  %v565_v40 = vpack.c.bf16 %v558_v37, %v551_v36  ;;  %v4002_v41 = vld [vmem:[%s5843_s2 + $0x100] ss:$8 sps:$4 sm:$0xff]   ;;  %v568_v42 = vpack.c.bf16 %v561_v39, %v554_v38  ;;  %v4007_v43 = vld [vmem:[%s5843_s2 + $0x114] ss:$8 sps:$4 sm:$0xff]   ;;  %v4095_v45 = vld [vmem:[%s5843_s2 + $0x304] ss:$8 sps:$4 sm:$0xff]  }
  0x4c   : > { %v4005_v46 = vld [vmem:[%s5843_s2 + $0x110] ss:$8 sps:$4 sm:$0xff]   ;;  %v4100_v47 = vld [vmem:[%s5843_s2 + $0x300] ss:$8 sps:$4 sm:$0xff]   ;;  %v4010_v48 = vld [vmem:[%s5843_s2 + $0x124] ss:$8 sps:$4 sm:$0xff]   ;;  %1305 = vmatprep.subr.bf16.mxu1 %v4095_v45 }
  0x4d   : > { %v4008_v50 = vld [vmem:[%s5843_s2 + $0x120] ss:$8 sps:$4 sm:$0xff]   ;;  %1306 = vmatpush1.bf16.msra.mxu1 %v4100_v47  ;;  %v4103_v54 = vld [vmem:[%s5845_s4 + $0x4] ss:$8 sps:$4 sm:$0xff]   ;;  %v4013_v55 = vld [vmem:[%s5843_s2 + $0x134] ss:$8 sps:$4 sm:$0xff]  }
  0x4e   : > { %1185 = vmatpush1.bf16.msra.mxu0 %v3968_v9  ;;  %v564_v51 = vld [vmem:[%s4803_s17 + $0x68] sm:$0xff]  ;;  %v4106_v56 = vld [vmem:[%s5845_s4 + $0x14] ss:$8 sps:$4 sm:$0xff]   ;;  %v4011_v57 = vld [vmem:[%s5843_s2 + $0x130] ss:$8 sps:$4 sm:$0xff]   ;;  %1558 = vmatprep.subr.bf16.mxu1 %v4103_v54  ;;  %s4531_s30 = scalar_lea.vmem %s4530_s16, 1792 }
  0x4f   : > { %1186 = vmatprep.subr.bf16.mxu0 %v3969_v10  ;;  %v571_v52 = vpack.c.bf16 %v564_v51, %v557_v49  ;;  %v4101_v53 = vld [vmem:[%s5845_s4] ss:$8 sps:$4 sm:$0xff]   ;;  %v4104_v58 = vld [vmem:[%s5845_s4 + $0x10] ss:$8 sps:$4 sm:$0xff]   ;;  %v4109_v59 = vld [vmem:[%s5845_s4 + $0x24] ss:$8 sps:$4 sm:$0xff]  }
  0x50   : > { %v4016_v60 = vld [vmem:[%s5843_s2 + $0x144] ss:$8 sps:$4 sm:$0xff]   ;;  %v4014_v61 = vld [vmem:[%s5843_s2 + $0x140] ss:$8 sps:$4 sm:$0xff]   ;;  %v4112_v63 = vld [vmem:[%s5845_s4 + $0x34] ss:$8 sps:$4 sm:$0xff]  }
  0x51   : > { %3612 = vmatmul.mubr.msk.bf16.vlgmr.msra.gmra.mrb[0].mxu1 %vm1172_vm0, %v571_v52  ;;  %v4107_v62 = vld [vmem:[%s5845_s4 + $0x20] ss:$8 sps:$4 sm:$0xff]   ;;  %v4019_v0 = vld [vmem:[%s5843_s2 + $0x154] ss:$8 sps:$4 sm:$0xff]   ;;  %v4017_v1 = vld [vmem:[%s5843_s2 + $0x150] ss:$8 sps:$4 sm:$0xff]  }
  0x52   : > { %1187 = vmatpush1.bf16.msra.mxu0 %v3971_v11  ;;  %1559 = vmatpush1.bf16.msra.mxu1 %v4101_v53  ;;  %v4110_v2 = vld [vmem:[%s5845_s4 + $0x30] ss:$8 sps:$4 sm:$0xff]   ;;  %v4115_v3 = vld [vmem:[%s5845_s4 + $0x44] ss:$8 sps:$4 sm:$0xff]   ;;  %v4020_v5 = vld [vmem:[%s5843_s2 + $0x160] ss:$8 sps:$4 sm:$0xff]  }
  0x53   : > { %1188 = vmatprep.subr.bf16.mxu0 %v3972_v12  ;;  %1560 = vmatprep.subr.bf16.mxu1 %v4106_v56  ;;  %v4022_v4 = vld [vmem:[%s5843_s2 + $0x164] ss:$8 sps:$4 sm:$0xff]   ;;  %v4025_v6 = vld [vmem:[%s5843_s2 + $0x174] ss:$8 sps:$4 sm:$0xff]   ;;  %v4113_v7 = vld [vmem:[%s5845_s4 + $0x40] ss:$8 sps:$4 sm:$0xff]  }
  0x54   : > { %v4118_v8 = vld [vmem:[%s5845_s4 + $0x54] ss:$8 sps:$4 sm:$0xff]   ;;  %v4116_v9 = vld [vmem:[%s5845_s4 + $0x50] ss:$8 sps:$4 sm:$0xff]   ;;  %v4121_v11 = vld [vmem:[%s5845_s4 + $0x64] ss:$8 sps:$4 sm:$0xff]  }
  0x55   : > { %v4023_v10 = vld [vmem:[%s5843_s2 + $0x170] ss:$8 sps:$4 sm:$0xff]   ;;  %v4028_v12 = vld [vmem:[%s5843_s2 + $0x184] ss:$8 sps:$4 sm:$0xff]   ;;  %v4119_v13 = vld [vmem:[%s5845_s4 + $0x60] ss:$8 sps:$4 sm:$0xff]  }
  0x56   : > { %1189 = vmatpush1.bf16.msra.mxu0 %v3974_v16  ;;  %1561 = vmatpush1.bf16.msra.mxu1 %v4104_v58  ;;  %v4026_v14 = vld [vmem:[%s5843_s2 + $0x180] ss:$8 sps:$4 sm:$0xff]   ;;  %v4124_v15 = vld [vmem:[%s5845_s4 + $0x74] ss:$8 sps:$4 sm:$0xff]   ;;  %v4046_v36 = vld [vmem:[%s5843_s2 + $0x1e4] ss:$8 sps:$4 sm:$0xff]  }
  0x57   : > { %1190 = vmatprep.subr.bf16.mxu0 %v3975_v17  ;;  %1562 = vmatprep.subr.bf16.mxu1 %v4109_v59  ;;  %v4031_v16 = vld [vmem:[%s5843_s2 + $0x194] ss:$8 sps:$4 sm:$0xff]   ;;  %v4122_v17 = vld [vmem:[%s5845_s4 + $0x70] ss:$8 sps:$4 sm:$0xff]   ;;  %v4137_v37 = vld [vmem:[%s5845_s4 + $0xc0] ss:$8 sps:$4 sm:$0xff]  }
  0x58   : > { %v4044_v38 = vld [vmem:[%s5843_s2 + $0x1e0] ss:$8 sps:$4 sm:$0xff]   ;;  %v4049_v39 = vld [vmem:[%s5843_s2 + $0x1f4] ss:$8 sps:$4 sm:$0xff]   ;;  %v4053_v51 = vld [vmem:[%s5843_s2 + $0x210] ss:$8 sps:$4 sm:$0xff]  }
  0x59   : > { %v556_v45 = vld [vmem:[%s4803_s17 + $0x28] sm:$0xff]  ;;  %v4055_v49 = vld [vmem:[%s5843_s2 + $0x214] ss:$8 sps:$4 sm:$0xff]   ;;  %v4065_v59 = vld [vmem:[%s5843_s2 + $0x250] ss:$8 sps:$4 sm:$0xff]  }
  0x5a   : > { %1191 = vmatpush1.bf16.msra.mxu0 %v3977_v18  ;;  %1563 = vmatpush1.bf16.msra.mxu1 %v4107_v62  ;;  %v4029_v18 = vld [vmem:[%s5843_s2 + $0x190] ss:$8 sps:$4 sm:$0xff]   ;;  %v4050_v47 = vld [vmem:[%s5843_s2 + $0x200] ss:$8 sps:$4 sm:$0xff]   ;;  %v4058_v52 = vld [vmem:[%s5843_s2 + $0x224] ss:$8 sps:$4 sm:$0xff]  }
  0x5b   : > { %1192 = vmatprep.subr.bf16.mxu0 %v3978_v19  ;;  %1564 = vmatprep.subr.bf16.mxu1 %v4112_v63  ;;  %v4127_v19 = vld [vmem:[%s5845_s4 + $0x84] ss:$8 sps:$4 sm:$0xff]   ;;  %v4056_v53 = vld [vmem:[%s5843_s2 + $0x220] ss:$8 sps:$4 sm:$0xff]   ;;  %v4061_v54 = vld [vmem:[%s5843_s2 + $0x234] ss:$8 sps:$4 sm:$0xff]  }
  0x5c   : > { %v4064_v56 = vld [vmem:[%s5843_s2 + $0x244] ss:$8 sps:$4 sm:$0xff]   ;;  %v4067_v58 = vld [vmem:[%s5843_s2 + $0x254] ss:$8 sps:$4 sm:$0xff]   ;;  %v4071_v63 = vld [vmem:[%s5843_s2 + $0x270] ss:$8 sps:$4 sm:$0xff]  }
  0x5d   : > { %v4073_v62 = vld [vmem:[%s5843_s2 + $0x274] ss:$8 sps:$4 sm:$0xff]  }
  0x5e   : > { %1193 = vmatpush1.bf16.msra.mxu0 %v3980_v20  ;;  %1565 = vmatpush1.bf16.msra.mxu1 %v4110_v2  ;;  %v4034_v20 = vld [vmem:[%s5843_s2 + $0x1a4] ss:$8 sps:$4 sm:$0xff]   ;;  %v4079_v2 = vld [vmem:[%s5843_s2 + $0x294] ss:$8 sps:$4 sm:$0xff]  }
  0x5f   : > { %1194 = vmatprep.subr.bf16.mxu0 %v3981_v21  ;;  %1566 = vmatprep.subr.bf16.mxu1 %v4115_v3  ;;  %v4125_v21 = vld [vmem:[%s5845_s4 + $0x80] ss:$8 sps:$4 sm:$0xff]   ;;  %v4077_v3 = vld [vmem:[%s5843_s2 + $0x290] ss:$8 sps:$4 sm:$0xff]  }
  0x62   : > { %1195 = vmatpush1.bf16.msra.mxu0 %v3983_v22  ;;  %1567 = vmatpush1.bf16.msra.mxu1 %v4113_v7  ;;  %v4032_v22 = vld [vmem:[%s5843_s2 + $0x1a0] ss:$8 sps:$4 sm:$0xff]   ;;  %v4083_v7 = vld [vmem:[%s5843_s2 + $0x2b0] ss:$8 sps:$4 sm:$0xff]  }
  0x63   : > { %1196 = vmatprep.subr.bf16.mxu0 %v3984_v23  ;;  %1568 = vmatprep.subr.bf16.mxu1 %v4118_v8  ;;  %v4130_v23 = vld [vmem:[%s5845_s4 + $0x94] ss:$8 sps:$4 sm:$0xff]   ;;  %v4088_v8 = vld [vmem:[%s5843_s2 + $0x2c4] ss:$8 sps:$4 sm:$0xff]  }
  0x66   : > { %1197 = vmatpush1.bf16.msra.mxu0 %v3986_v24  ;;  %1569 = vmatpush1.bf16.msra.mxu1 %v4116_v9  ;;  %v4037_v24 = vld [vmem:[%s5843_s2 + $0x1b4] ss:$8 sps:$4 sm:$0xff]   ;;  %v4086_v9 = vld [vmem:[%s5843_s2 + $0x2c0] ss:$8 sps:$4 sm:$0xff]  }
  0x67   : > { %1198 = vmatprep.subr.bf16.mxu0 %v3987_v25  ;;  %1570 = vmatprep.subr.bf16.mxu1 %v4121_v11  ;;  %v4128_v25 = vld [vmem:[%s5845_s4 + $0x90] ss:$8 sps:$4 sm:$0xff]  }
  0x68   : > { %v4089_v11 = vld [vmem:[%s5843_s2 + $0x2d0] ss:$8 sps:$4 sm:$0xff]  }
  0x6a   : > { %1199 = vmatpush1.bf16.msra.mxu0 %v3989_v26  ;;  %1571 = vmatpush1.bf16.msra.mxu1 %v4119_v13  ;;  %v4035_v26 = vld [vmem:[%s5843_s2 + $0x1b0] ss:$8 sps:$4 sm:$0xff]   ;;  %v4092_v13 = vld [vmem:[%s5843_s2 + $0x2e0] ss:$8 sps:$4 sm:$0xff]  }
  0x6b   : > { %1200 = vmatprep.subr.bf16.mxu0 %v3990_v27  ;;  %1572 = vmatprep.subr.bf16.mxu1 %v4124_v15  ;;  %v4133_v27 = vld [vmem:[%s5845_s4 + $0xa4] ss:$8 sps:$4 sm:$0xff]   ;;  %v4097_v15 = vld [vmem:[%s5843_s2 + $0x2f0] ss:$8 sps:$4 sm:$0xff]  }
  0x6e   : > { %1201 = vmatpush1.bf16.msra.mxu0 %v3992_v28  ;;  %1573 = vmatpush1.bf16.msra.mxu1 %v4122_v17  ;;  %v4040_v28 = vld [vmem:[%s5843_s2 + $0x1c4] ss:$8 sps:$4 sm:$0xff]   ;;  %v562_v17 = vld [vmem:[%s4803_s17 + $0x58] sm:$0xff] }
  0x6f   : > { %1202 = vmatprep.subr.bf16.mxu0 %v3993_v29  ;;  %1574 = vmatprep.subr.bf16.mxu1 %v4127_v19  ;;  %v4131_v29 = vld [vmem:[%s5845_s4 + $0xa0] ss:$8 sps:$4 sm:$0xff]   ;;  %v4142_v19 = vld [vmem:[%s5845_s4 + $0xd4] ss:$8 sps:$4 sm:$0xff]  }
  0x72   : > { %1203 = vmatpush1.bf16.msra.mxu0 %v3995_v30  ;;  %1575 = vmatpush1.bf16.msra.mxu1 %v4125_v21  ;;  %v4038_v30 = vld [vmem:[%s5843_s2 + $0x1c0] ss:$8 sps:$4 sm:$0xff]   ;;  %v4145_v21 = vld [vmem:[%s5845_s4 + $0xe4] ss:$8 sps:$4 sm:$0xff]  }
  0x73   : > { %1204 = vmatprep.subr.bf16.mxu0 %v3996_v31  ;;  %1576 = vmatprep.subr.bf16.mxu1 %v4130_v23  ;;  %v4136_v31 = vld [vmem:[%s5845_s4 + $0xb4] ss:$8 sps:$4 sm:$0xff]  }
  0x76   : > { %1205 = vmatpush1.bf16.msra.mxu0 %v3998_v32  ;;  %v4043_v32 = vld [vmem:[%s5843_s2 + $0x1d4] ss:$8 sps:$4 sm:$0xff]   ;;  %1577 = vmatpush1.bf16.msra.mxu1 %v4128_v25 }
  0x77   : > { %1206 = vmatprep.subr.bf16.mxu0 %v3999_v33  ;;  %1578 = vmatprep.subr.bf16.mxu1 %v4133_v27  ;;  %v4134_v33 = vld [vmem:[%s5845_s4 + $0xb0] ss:$8 sps:$4 sm:$0xff]   ;;  %v4148_v25 = vld [vmem:[%s5845_s4 + $0xf4] ss:$8 sps:$4 sm:$0xff]  }
  0x78   : > { %v4146_v27 = vld [vmem:[%s5845_s4 + $0xf0] ss:$8 sps:$4 sm:$0xff]  }
  0x7a   : > { %1207 = vmatpush1.bf16.msra.mxu0 %v4001_v34  ;;  %v4041_v34 = vld [vmem:[%s5843_s2 + $0x1d0] ss:$8 sps:$4 sm:$0xff]   ;;  %1579 = vmatpush1.bf16.msra.mxu1 %v4131_v29  ;;  %v4151_v29 = vld [vmem:[%s5847_s6 + $0x4] ss:$8 sps:$4 sm:$0xff]  }
  0x7b   : > { %1219 = vmatprep.subr.bf16.mxu0 %v4004_v35  ;;  %v4139_v35 = vld [vmem:[%s5845_s4 + $0xc4] ss:$8 sps:$4 sm:$0xff]   ;;  %1580 = vmatprep.subr.bf16.mxu1 %v4136_v31 }
  0x7d   : > { %1209 = vmatmul.mubr.bf16.vlgmr.msra.gmra.mrb[0].mxu0 %v565_v40  ;;  %v4047_v40 = vld [vmem:[%s5843_s2 + $0x1f0] ss:$8 sps:$4 sm:$0xff]  }
  0x7e   : > { %1220 = vmatpush1.bf16.msra.mxu0 %v4002_v41  ;;  %1251 = vmatprep.mubr.bf16.mxu0 %v568_v42  ;;  %v553_v41 = vld [vmem:[%s4803_s17 + $0x10] sm:$0xff]  ;;  %v560_v42 = vld [vmem:[%s4803_s17 + $0x48] sm:$0xff] }
  0x7f   : > { %1221 = vmatprep.subr.bf16.mxu0 %v4007_v43  ;;  %1581 = vmatpush1.bf16.msra.mxu1 %v4134_v33  ;;  %v4052_v43 = vld [vmem:[%s5843_s2 + $0x204] ss:$8 sps:$4 sm:$0xff]   ;;  %v670_v33 = vld [vmem:[%s5844_s3] sm:$0x3] }
  0x80   : > { %1582 = vmatprep.subr.bf16.mxu1 %v4139_v35 }
  0x82   : > { %1222 = vmatpush1.bf16.msra.mxu0 %v4005_v46  ;;  %v563_v46 = vld [vmem:[%s4803_s17 + $0x60] sm:$0xff] }
  0x83   : > { %1223 = vmatprep.subr.bf16.mxu0 %v4010_v48  ;;  %1583 = vmatpush1.bf16.msra.mxu1 %v4137_v37  ;;  %v567_v48 = vpack.c.bf16 %v560_v42, %v553_v41 }
  0x84   : > { %1584 = vmatprep.subr.bf16.mxu1 %v4142_v19  ;;  %v4193_v19 = vld [vmem:[%s5847_s6 + $0xe4] ss:$8 sps:$4 sm:$0xff]  }
  0x86   : > { %1224 = vmatpush1.bf16.msra.mxu0 %v4008_v50  ;;  %v570_v50 = vpack.c.bf16 %v563_v46, %v556_v45 }
  0x87   : > { %1225 = vmatprep.subr.bf16.mxu0 %v4013_v55  ;;  %v4059_v55 = vld [vmem:[%s5843_s2 + $0x230] ss:$8 sps:$4 sm:$0xff]  }
  0x8a   : > { %1226 = vmatpush1.bf16.msra.mxu0 %v4011_v57  ;;  %v4062_v57 = vld [vmem:[%s5843_s2 + $0x240] ss:$8 sps:$4 sm:$0xff]  }
  0x8b   : > { %1227 = vmatprep.subr.bf16.mxu0 %v4016_v60  ;;  %v4070_v60 = vld [vmem:[%s5843_s2 + $0x264] ss:$8 sps:$4 sm:$0xff]  }
  0x8e   : > { %1228 = vmatpush1.bf16.msra.mxu0 %v4014_v61  ;;  %v4068_v61 = vld [vmem:[%s5843_s2 + $0x260] ss:$8 sps:$4 sm:$0xff]  }
  0x8f   : > { %1229 = vmatprep.subr.bf16.mxu0 %v4019_v0  ;;  %v4076_v0 = vld [vmem:[%s5843_s2 + $0x284] ss:$8 sps:$4 sm:$0xff]  }
  0x92   : > { %1230 = vmatpush1.bf16.msra.mxu0 %v4017_v1  ;;  %v4074_v1 = vld [vmem:[%s5843_s2 + $0x280] ss:$8 sps:$4 sm:$0xff]  }
  0x93   : > { %1231 = vmatprep.subr.bf16.mxu0 %v4022_v4  ;;  %v4082_v4 = vld [vmem:[%s5843_s2 + $0x2a4] ss:$8 sps:$4 sm:$0xff]  }
  0x96   : > { %1232 = vmatpush1.bf16.msra.mxu0 %v4020_v5  ;;  %v4080_v5 = vld [vmem:[%s5843_s2 + $0x2a0] ss:$8 sps:$4 sm:$0xff]  }
  0x97   : > { %1233 = vmatprep.subr.bf16.mxu0 %v4025_v6  ;;  %v4085_v6 = vld [vmem:[%s5843_s2 + $0x2b4] ss:$8 sps:$4 sm:$0xff]  }
  0x9a   : > { %1234 = vmatpush1.bf16.msra.mxu0 %v4023_v10  ;;  %v4091_v10 = vld [vmem:[%s5843_s2 + $0x2d4] ss:$8 sps:$4 sm:$0xff]  }
  0x9b   : > { %1235 = vmatprep.subr.bf16.mxu0 %v4028_v12  ;;  %v4094_v12 = vld [vmem:[%s5843_s2 + $0x2e4] ss:$8 sps:$4 sm:$0xff]  }
  0x9e   : > { %1236 = vmatpush1.bf16.msra.mxu0 %v4026_v14  ;;  %v4099_v14 = vld [vmem:[%s5843_s2 + $0x2f4] ss:$8 sps:$4 sm:$0xff]  }
  0x9f   : > { %1237 = vmatprep.subr.bf16.mxu0 %v4031_v16  ;;  %v555_v16 = vld [vmem:[%s4803_s17 + $0x20] sm:$0xff]  ;;  %s3511_s17 = sshll.u32 %s5889_s24, 3 }
  0xa0   : > { %s541_s8 = scalar_lea.vmem %s5842_s1, %s3511_s17  ;;  %s548_s27 = scalar_lea.vmem %s5856_s15, %s3511_s17 }
  0xa1   : > { %s3896_s17 = smul.u32 56, %s520_s20 }
  0xa2   : > { %1238 = vmatpush1.bf16.msra.mxu0 %v4029_v18  ;;  %v569_v18 = vpack.c.bf16 %v562_v17, %v555_v16  ;;  %v4185_v16 = vld [vmem:[%s5847_s6 + $0xc0] ss:$8 sps:$4 sm:$0xff]   ;;  %v4190_v17 = vld [vmem:[%s5847_s6 + $0xd4] ss:$8 sps:$4 sm:$0xff]  }
  0xa3   : > { %1239 = vmatprep.subr.bf16.mxu0 %v4034_v20  ;;  %v4140_v20 = vld [vmem:[%s5845_s4 + $0xd0] ss:$8 sps:$4 sm:$0xff]   ;;  %s5773_s26 = scalar_lea.vmem [#allocation5], %s3896_s17 }
  0xa4   : > { %1585 = vmatpush1.bf16.msra.mxu1 %v4140_v20  ;;  %v4191_v20 = vld [vmem:[%s5847_s6 + $0xe0] ss:$8 sps:$4 sm:$0xff]  }
  0xa5   : > { %1586 = vmatprep.subr.bf16.mxu1 %v4145_v21  ;;  %v4196_v21 = vld [vmem:[%s5847_s6 + $0xf4] ss:$8 sps:$4 sm:$0xff]  }
  0xa6   : > { %1240 = vmatpush1.bf16.msra.mxu0 %v4032_v22  ;;  %v4143_v22 = vld [vmem:[%s5845_s4 + $0xe0] ss:$8 sps:$4 sm:$0xff]  }
  0xa7   : > { %1241 = vmatprep.subr.bf16.mxu0 %v4037_v24 }
  0xa8   : > { %1587 = vmatpush1.bf16.msra.mxu1 %v4143_v22  ;;  %v4194_v22 = vld [vmem:[%s5847_s6 + $0xf0] ss:$8 sps:$4 sm:$0xff]  }
  0xa9   : > { %1588 = vmatprep.subr.bf16.mxu1 %v4148_v25 }
  0xaa   : > { %1242 = vmatpush1.bf16.msra.mxu0 %v4035_v26 }
  0xab   : > { %1243 = vmatprep.subr.bf16.mxu0 %v4040_v28 }
  0xac   : > { %1589 = vmatpush1.bf16.msra.mxu1 %v4146_v27 }
  0xad   : > { %1811 = vmatprep.subr.bf16.mxu1 %v4151_v29 }
  0xae   : > { %1244 = vmatpush1.bf16.msra.mxu0 %v4038_v30  ;;  %v672_v30 = vlaneseq }
  0xaf   : > { %1245 = vmatprep.subr.bf16.mxu0 %v4043_v32 }
  0xb0   : > { %v5181_v31 = vshrl.u32 %v672_v30, 7 }
  0xb2   : > { %1246 = vmatpush1.bf16.msra.mxu0 %v4041_v34  ;;  %v5184_v32 = vsub.s32 0, %v5181_v31  ;;  %v5190_v34 = vsub.s32 1, %v5181_v31 }
  0xb3   : > { %1247 = vmatprep.subr.bf16.mxu0 %v4046_v36 }
  0xb4   : > { %v675_v35 = vrot.slane %v670_v33, %v5184_v32  ;;  %v679_v36 = vrot.slane %v670_v33, %v5190_v34 }
  0xb6   : > { %1248 = vmatpush1.bf16.msra.mxu0 %v4044_v38 }
  0xb7   : > { %1249 = vmatprep.subr.bf16.mxu0 %v4049_v39 }
  0xba   : > { %1250 = vmatpush1.bf16.msra.mxu0 %v4047_v40 }
  0xbb   : > { %1262 = vmatprep.subr.bf16.mxu0 %v4052_v43 }
  0xbd   : > { %1252 = vmatmul.mubr.bf16.vlgmr.msra.gmra.mrb[0].mxu0 %v567_v48 }
  0xbe   : > { %1263 = vmatpush1.bf16.msra.mxu0 %v4050_v47  ;;  %1294 = vmatprep.mubr.bf16.mxu0 %v570_v50 }
  0xbf   : > { %1264 = vmatprep.subr.bf16.mxu0 %v4055_v49 }
  0xc2   : > { %1265 = vmatpush1.bf16.msra.mxu0 %v4053_v51 }
  0xc3   : > { %1266 = vmatprep.subr.bf16.mxu0 %v4058_v52 }
  0xc6   : > { %1267 = vmatpush1.bf16.msra.mxu0 %v4056_v53 }
  0xc7   : > { %1268 = vmatprep.subr.bf16.mxu0 %v4061_v54 }
  0xca   : > { %1269 = vmatpush1.bf16.msra.mxu0 %v4059_v55 }
  0xcb   : > { %1270 = vmatprep.subr.bf16.mxu0 %v4064_v56  ;;  %v4149_v56 = vld [vmem:[%s5847_s6] ss:$8 sps:$4 sm:$0xff]  }
  0xce   : > { %1271 = vmatpush1.bf16.msra.mxu0 %v4062_v57  ;;  %v4154_v57 = vld [vmem:[%s5847_s6 + $0x14] ss:$8 sps:$4 sm:$0xff]  }
  0xcf   : > { %1272 = vmatprep.subr.bf16.mxu0 %v4067_v58  ;;  %v4152_v58 = vld [vmem:[%s5847_s6 + $0x10] ss:$8 sps:$4 sm:$0xff]  }
  0xd2   : > { %1273 = vmatpush1.bf16.msra.mxu0 %v4065_v59  ;;  %v4157_v59 = vld [vmem:[%s5847_s6 + $0x24] ss:$8 sps:$4 sm:$0xff]  }
  0xd3   : > { %1274 = vmatprep.subr.bf16.mxu0 %v4070_v60  ;;  %v4155_v60 = vld [vmem:[%s5847_s6 + $0x20] ss:$8 sps:$4 sm:$0xff]  }
  0xd6   : > { %1275 = vmatpush1.bf16.msra.mxu0 %v4068_v61  ;;  %v4160_v61 = vld [vmem:[%s5847_s6 + $0x34] ss:$8 sps:$4 sm:$0xff]  }
  0xd7   : > { %1276 = vmatprep.subr.bf16.mxu0 %v4073_v62  ;;  %v4158_v62 = vld [vmem:[%s5847_s6 + $0x30] ss:$8 sps:$4 sm:$0xff]  }
  0xda   : > { %1277 = vmatpush1.bf16.msra.mxu0 %v4071_v63  ;;  %v4163_v63 = vld [vmem:[%s5847_s6 + $0x44] ss:$8 sps:$4 sm:$0xff]  }
  0xdb   : > { %1278 = vmatprep.subr.bf16.mxu0 %v4076_v0  ;;  %v4161_v0 = vld [vmem:[%s5847_s6 + $0x40] ss:$8 sps:$4 sm:$0xff]  }
  0xde   : > { %1279 = vmatpush1.bf16.msra.mxu0 %v4074_v1  ;;  %v4166_v1 = vld [vmem:[%s5847_s6 + $0x54] ss:$8 sps:$4 sm:$0xff]  }
  0xdf   : > { %1280 = vmatprep.subr.bf16.mxu0 %v4079_v2  ;;  %v4164_v2 = vld [vmem:[%s5847_s6 + $0x50] ss:$8 sps:$4 sm:$0xff]  }
  0xe2   : > { %1281 = vmatpush1.bf16.msra.mxu0 %v4077_v3  ;;  %v4169_v3 = vld [vmem:[%s5847_s6 + $0x64] ss:$8 sps:$4 sm:$0xff]  }
  0xe3   : > { %1282 = vmatprep.subr.bf16.mxu0 %v4082_v4  ;;  %v4167_v4 = vld [vmem:[%s5847_s6 + $0x60] ss:$8 sps:$4 sm:$0xff]  }
  0xe6   : > { %1283 = vmatpush1.bf16.msra.mxu0 %v4080_v5  ;;  %v4172_v5 = vld [vmem:[%s5847_s6 + $0x74] ss:$8 sps:$4 sm:$0xff]  }
  0xe7   : > { %1284 = vmatprep.subr.bf16.mxu0 %v4085_v6  ;;  %v4170_v6 = vld [vmem:[%s5847_s6 + $0x70] ss:$8 sps:$4 sm:$0xff]  }
  0xea   : > { %1285 = vmatpush1.bf16.msra.mxu0 %v4083_v7  ;;  %v4175_v7 = vld [vmem:[%s5847_s6 + $0x84] ss:$8 sps:$4 sm:$0xff]  }
  0xeb   : > { %1286 = vmatprep.subr.bf16.mxu0 %v4088_v8  ;;  %v4173_v8 = vld [vmem:[%s5847_s6 + $0x80] ss:$8 sps:$4 sm:$0xff]  }
  0xee   : > { %1287 = vmatpush1.bf16.msra.mxu0 %v4086_v9  ;;  %v4178_v9 = vld [vmem:[%s5847_s6 + $0x94] ss:$8 sps:$4 sm:$0xff]  }
  0xef   : > { %1288 = vmatprep.subr.bf16.mxu0 %v4091_v10  ;;  %v4176_v10 = vld [vmem:[%s5847_s6 + $0x90] ss:$8 sps:$4 sm:$0xff]  }
  0xf2   : > { %1289 = vmatpush1.bf16.msra.mxu0 %v4089_v11  ;;  %v4181_v11 = vld [vmem:[%s5847_s6 + $0xa4] ss:$8 sps:$4 sm:$0xff]  }
  0xf3   : > { %1290 = vmatprep.subr.bf16.mxu0 %v4094_v12  ;;  %v4179_v12 = vld [vmem:[%s5847_s6 + $0xa0] ss:$8 sps:$4 sm:$0xff]  }
  0xf6   : > { %1291 = vmatpush1.bf16.msra.mxu0 %v4092_v13  ;;  %v4184_v13 = vld [vmem:[%s5847_s6 + $0xb4] ss:$8 sps:$4 sm:$0xff]  }
  0xf7   : > { %1292 = vmatprep.subr.bf16.mxu0 %v4099_v14  ;;  %v4182_v14 = vld [vmem:[%s5847_s6 + $0xb0] ss:$8 sps:$4 sm:$0xff]  }
  0xfa   : > { %1293 = vmatpush1.bf16.msra.mxu0 %v4097_v15  ;;  %v4187_v15 = vld [vmem:[%s5847_s6 + $0xc4] ss:$8 sps:$4 sm:$0xff]  }
  0xfd   : > { %1295 = vmatmul.mubr.bf16.vlgmr.msra.gmra.mrb[0].mxu0 %v569_v18  ;;  %v4188_v18 = vld [vmem:[%s5847_s6 + $0xd0] ss:$8 sps:$4 sm:$0xff]  }
 0x124   : > { %v1339_v23 = vpop.f32.mrb[0].mxu1 }
 0x125   : > { %v1341_v24 = vpop.f32.mrb[1].mxu1 }
 0x126   : > { %v1343_v26 = vpop.f32.mrb[2].mxu1 }
 0x127   : > { %v1345_v28 = vpop.f32.mrb[3].mxu1 }
 0x1d0   : > { %v1296_v37 = vpop.f32.mrb[0].mxu0 }
 0x1d1   : > { %v3880_v38 = vadd.f32 %v1296_v37, %v675_v35  ;;  %v1298_v39 = vpop.f32.mrb[1].mxu0 }
 0x1d2   : > { %v3882_v40 = vadd.f32 %v1298_v39, %v679_v36  ;;  %v1300_v41 = vpop.f32.mrb[2].mxu0 }
 0x1d3   : > { %v3881_v42 = vadd.f32 %v3880_v38, %v1339_v23  ;;  %v3884_v43 = vadd.f32 %v1300_v41, %v675_v35  ;;  %v1302_v45 = vpop.f32.mrb[3].mxu0  ;;  %v1386_v23 = vld [vmem:[%s5846_s5] sm:$0x3] }
 0x1d4   : > { %v3883_v46 = vadd.f32 %v3882_v40, %v1341_v24  ;;  %v3886_v47 = vadd.f32 %v1302_v45, %v679_v36  ;;  %v1391_v24 = vrot.slane %v1386_v23, %v5184_v32  ;;  %v1395_v25 = vrot.slane %v1386_v23, %v5190_v34  ;;  %v4197_v45 = vld [vmem:[#allocation2] ss:$8 sps:$4 sm:$0xff]  }
 0x1d5   : > { %v3885_v48 = vadd.f32 %v3884_v43, %v1343_v26  ;;  %v1348_v50 = vmax.f32 %v3881_v42, 0.0  ;;  %v4199_v43 = vld [vmem:[#allocation2 + $0x4] ss:$8 sps:$4 sm:$0xff]  }
 0x1d6   : > { %v3887_v49 = vadd.f32 %v3886_v47, %v1345_v28  ;;  %v1349_v52 = vmax.f32 %v3883_v46, 0.0  ;;  %v4202_v46 = vld [vmem:[#allocation2 + $0x14] ss:$8 sps:$4 sm:$0xff]   ;;  %v4200_v47 = vld [vmem:[#allocation2 + $0x10] ss:$8 sps:$4 sm:$0xff]  }
 0x1d7   : > { %v1350_v51 = vmax.f32 %v3885_v48, 0.0  ;;  %v4205_v48 = vld [vmem:[#allocation2 + $0x24] ss:$8 sps:$4 sm:$0xff]  }
 0x1d8   : > { %v1351_v53 = vmax.f32 %v3887_v49, 0.0  ;;  %v4203_v49 = vld [vmem:[#allocation2 + $0x20] ss:$8 sps:$4 sm:$0xff]  }
 0x1d9   : > { %v1352_v54 = vpack.c.bf16 %v1350_v51, %v1348_v50  ;;  %v4208_v50 = vld [vmem:[#allocation2 + $0x34] ss:$8 sps:$4 sm:$0xff]   ;;  %v4206_v51 = vld [vmem:[#allocation2 + $0x30] ss:$8 sps:$4 sm:$0xff]  }
 0x1da   : > { %v1353_v55 = vpack.c.bf16 %v1351_v53, %v1349_v52  ;;  %v4211_v52 = vld [vmem:[#allocation2 + $0x44] ss:$8 sps:$4 sm:$0xff]   ;;  %v4209_v53 = vld [vmem:[#allocation2 + $0x40] ss:$8 sps:$4 sm:$0xff]  }
 0x1dc   : > { %1590 = vmatprep.mubr.bf16.mxu1 %v1353_v55  ;;  %v4217_v55 = vld [vmem:[#allocation2 + $0x64] ss:$8 sps:$4 sm:$0xff]  }
 0x1dd   : > { %1591 = vmatmul.mubr.bf16.vlgmr.msra.gmra.mrb[4].mxu1 %v1352_v54  ;;  %v4212_v54 = vld [vmem:[#allocation2 + $0x50] ss:$8 sps:$4 sm:$0xff]  }
 0x1de   : > { %1812 = vmatpush1.bf16.msra.mxu1 %v4149_v56  ;;  %v4215_v56 = vld [vmem:[#allocation2 + $0x60] ss:$8 sps:$4 sm:$0xff]  }
 0x1df   : > { %1813 = vmatprep.subr.bf16.mxu1 %v4154_v57  ;;  %v4220_v57 = vld [vmem:[#allocation2 + $0x74] ss:$8 sps:$4 sm:$0xff]  }
 0x1e2   : > { %1814 = vmatpush1.bf16.msra.mxu1 %v4152_v58  ;;  %v4218_v58 = vld [vmem:[#allocation2 + $0x70] ss:$8 sps:$4 sm:$0xff]  }
 0x1e3   : > { %1815 = vmatprep.subr.bf16.mxu1 %v4157_v59  ;;  %v4223_v59 = vld [vmem:[%s5851_s10 + $0x4] ss:$8 sps:$4 sm:$0xff]  }
 0x1e6   : > { %1816 = vmatpush1.bf16.msra.mxu1 %v4155_v60  ;;  %v1639_v60 = vld [vmem:[%s5848_s7] sm:$0x3] }
 0x1e7   : > { %1817 = vmatprep.subr.bf16.mxu1 %v4160_v61  ;;  %v1648_v61 = vrot.slane %v1639_v60, %v5190_v34  ;;  %v1644_v23 = vrot.slane %v1639_v60, %v5184_v32  ;;  %v4247_v60 = vld [vmem:[%s5851_s10 + $0x84] ss:$8 sps:$4 sm:$0xff]  }
 0x1ea   : > { %1818 = vmatpush1.bf16.msra.mxu1 %v4158_v62 }
 0x1eb   : > { %1819 = vmatprep.subr.bf16.mxu1 %v4163_v63 }
 0x1ee   : > { %1820 = vmatpush1.bf16.msra.mxu1 %v4161_v0 }
 0x1ef   : > { %1821 = vmatprep.subr.bf16.mxu1 %v4166_v1 }
 0x1f2   : > { %1822 = vmatpush1.bf16.msra.mxu1 %v4164_v2 }
 0x1f3   : > { %1823 = vmatprep.subr.bf16.mxu1 %v4169_v3 }
 0x1f6   : > { %1824 = vmatpush1.bf16.msra.mxu1 %v4167_v4 }
 0x1f7   : > { %1825 = vmatprep.subr.bf16.mxu1 %v4172_v5 }
 0x1fa   : > { %1826 = vmatpush1.bf16.msra.mxu1 %v4170_v6 }
 0x1fb   : > { %1827 = vmatprep.subr.bf16.mxu1 %v4175_v7 }
 0x1fe   : > { %1828 = vmatpush1.bf16.msra.mxu1 %v4173_v8 }
 0x1ff   : > { %1829 = vmatprep.subr.bf16.mxu1 %v4178_v9 }
 0x202   : > { %1830 = vmatpush1.bf16.msra.mxu1 %v4176_v10 }
 0x203   : > { %1831 = vmatprep.subr.bf16.mxu1 %v4181_v11 }
 0x206   : > { %1832 = vmatpush1.bf16.msra.mxu1 %v4179_v12 }
 0x207   : > { %1833 = vmatprep.subr.bf16.mxu1 %v4184_v13 }
 0x20a   : > { %1834 = vmatpush1.bf16.msra.mxu1 %v4182_v14 }
 0x20b   : > { %1835 = vmatprep.subr.bf16.mxu1 %v4187_v15 }
 0x20e   : > { %1836 = vmatpush1.bf16.msra.mxu1 %v4185_v16 }
 0x20f   : > { %1837 = vmatprep.subr.bf16.mxu1 %v4190_v17 }
 0x212   : > { %1838 = vmatpush1.bf16.msra.mxu1 %v4188_v18 }
 0x213   : > { %1839 = vmatprep.subr.bf16.mxu1 %v4193_v19 }
 0x216   : > { %1840 = vmatpush1.bf16.msra.mxu1 %v4191_v20 }
 0x217   : > { %1841 = vmatprep.subr.bf16.mxu1 %v4196_v21 }
 0x21a   : > { %1842 = vmatpush1.bf16.msra.mxu1 %v4194_v22 }
 0x21b   : > { %2003 = vmatprep.subr.bf16.mxu1 %v4199_v43 }
 0x2b0   : > { %v1592_v26 = vpop.f32.mrb[4].mxu1 }
 0x2b1   : > { %v1593_v27 = vadd.f32 %v1592_v26, %v1391_v24  ;;  %v1594_v28 = vpop.f32.mrb[5].mxu1 }
 0x2b2   : > { %v1595_v29 = vadd.f32 %v1594_v28, %v1395_v25  ;;  %v1596_v30 = vpop.f32.mrb[6].mxu1 }
 0x2b3   : > { %v1597_v33 = vadd.f32 %v1596_v30, %v1391_v24  ;;  %v1598_v35 = vpop.f32.mrb[7].mxu1  ;;  %v1601_v37 = vmax.f32 %v1593_v27, 0.0  ;;  %v1886_v27 = vld [vmem:[%s541_s8] sm:$0xff] }
 0x2b4   : > { %v1599_v36 = vadd.f32 %v1598_v35, %v1395_v25  ;;  %v1602_v39 = vmax.f32 %v1595_v29, 0.0  ;;  %v1887_v35 = vld [vmem:[%s541_s8 + $0x8] sm:$0xff]  ;;  %s3387_s8 = sshll.u32 %s5773_s26, 4  ;;  %s5789_s8 = int_to_ptr.vmem [resolvable:$true] %s3387_s8 }
 0x2b5   : > { %v1603_v38 = vmax.f32 %v1597_v33, 0.0  ;;  %s4525_s22 = scalar_lea.vmem %s5789_s8, 896  ;;  %p4532_p2 = scmp.lt.s32.totalorder %s5789_s8, %s4530_s16 }
 0x2b6   : > { %v1604_v40 = vmax.f32 %v1599_v36, 0.0  ;;  %p4526_p6 = scmp.ne.s32.totalorder %s5789_s8, %s4525_s22  ;;  %p4533_p3 = scmp.lt.s32.totalorder %s4531_s30, %s4525_s22 }
 0x2b7   : > { %v1605_v41 = vpack.c.bf16 %v1603_v38, %v1601_v37 }
 0x2b8   : > { %v1606_v42 = vpack.c.bf16 %v1604_v40, %v1602_v39  ;;  %p4527_p10 = pnand %p4526_p6, %p5879_p9  ;;  %p4534_p4 = por %p4533_p3, %p4532_p2 }
 0x2ba   : > { %1843 = vmatprep.mubr.bf16.mxu1 %v1606_v42  ;;  %p4528_p12 = pneg %p4527_p10 }
 0x2bb   : > { %1844 = vmatmul.mubr.bf16.vlgmr.msra.gmra.mrb[8].mxu1 %v1605_v41 }
 0x2bc   : > { %2035 = vmatprep.mubr.bf16.mxu1 %v4596_v44  ;;  %2004 = vmatpush1.bf16.msra.mxu1 %v4197_v45  ;;  %v4214_v44 = vld [vmem:[#allocation2 + $0x54] ss:$8 sps:$4 sm:$0xff]   ;;  %v4221_v45 = vld [vmem:[%s5851_s10] ss:$8 sps:$4 sm:$0xff]   ;;  %p4535_p7 = pnand %p4534_p4, %p4528_p12 }
 0x2bd   : > { %2005 = vmatprep.subr.bf16.mxu1 %v4202_v46 }
 0x2c0   : > { %2006 = vmatpush1.bf16.msra.mxu1 %v4200_v47  ;;  %v4226_v47 = vld [vmem:[%s5851_s10 + $0x14] ss:$8 sps:$4 sm:$0xff]  }
 0x2c1   : > { %2007 = vmatprep.subr.bf16.mxu1 %v4205_v48  ;;  %v4224_v48 = vld [vmem:[%s5851_s10 + $0x10] ss:$8 sps:$4 sm:$0xff]  }
 0x2c4   : > { %2008 = vmatpush1.bf16.msra.mxu1 %v4203_v49  ;;  %v4229_v49 = vld [vmem:[%s5851_s10 + $0x24] ss:$8 sps:$4 sm:$0xff]  }
 0x2c5   : > { %2009 = vmatprep.subr.bf16.mxu1 %v4208_v50  ;;  %v4227_v50 = vld [vmem:[%s5851_s10 + $0x20] ss:$8 sps:$4 sm:$0xff]  }
 0x2c8   : > { %2010 = vmatpush1.bf16.msra.mxu1 %v4206_v51  ;;  %v4232_v51 = vld [vmem:[%s5851_s10 + $0x34] ss:$8 sps:$4 sm:$0xff]  }
 0x2c9   : > { %2011 = vmatprep.subr.bf16.mxu1 %v4211_v52  ;;  %v4230_v52 = vld [vmem:[%s5851_s10 + $0x30] ss:$8 sps:$4 sm:$0xff]  }
 0x2cc   : > { %2012 = vmatpush1.bf16.msra.mxu1 %v4209_v53  ;;  %v4235_v53 = vld [vmem:[%s5851_s10 + $0x44] ss:$8 sps:$4 sm:$0xff]  }
 0x2cd   : > { %2013 = vmatprep.subr.bf16.mxu1 %v4214_v44  ;;  %v4233_v44 = vld [vmem:[%s5851_s10 + $0x40] ss:$8 sps:$4 sm:$0xff]  }
 0x2d0   : > { %2014 = vmatpush1.bf16.msra.mxu1 %v4212_v54  ;;  %v4238_v54 = vld [vmem:[%s5851_s10 + $0x54] ss:$8 sps:$4 sm:$0xff]  }
 0x2d1   : > { %2015 = vmatprep.subr.bf16.mxu1 %v4217_v55  ;;  %v4236_v55 = vld [vmem:[%s5851_s10 + $0x50] ss:$8 sps:$4 sm:$0xff]  }
 0x2d4   : > { %2016 = vmatpush1.bf16.msra.mxu1 %v4215_v56  ;;  %v4241_v56 = vld [vmem:[%s5851_s10 + $0x64] ss:$8 sps:$4 sm:$0xff]  }
 0x2d5   : > { %2017 = vmatprep.subr.bf16.mxu1 %v4220_v57  ;;  %v4239_v57 = vld [vmem:[%s5851_s10 + $0x60] ss:$8 sps:$4 sm:$0xff]  }
 0x2d8   : > { %2018 = vmatpush1.bf16.msra.mxu1 %v4218_v58  ;;  %v4244_v58 = vld [vmem:[%s5851_s10 + $0x74] ss:$8 sps:$4 sm:$0xff]  }
 0x2d9   : > { %2256 = vmatprep.subr.bf16.mxu1 %v4223_v59  ;;  %v4242_v59 = vld [vmem:[%s5851_s10 + $0x70] ss:$8 sps:$4 sm:$0xff]  }
 0x38e   : > { %v1845_v62 = vpop.f32.mrb[8].mxu1 }
 0x38f   : > { %v1847_v63 = vpop.f32.mrb[9].mxu1  ;;  %v1846_v36 = vadd.f32 %v1845_v62, %v1644_v23  ;;  %v4250_v62 = vld [vmem:[%s5851_s10 + $0x94] ss:$8 sps:$4 sm:$0xff]  }
 0x390   : > { %v1848_v0 = vadd.f32 %v1847_v63, %v1648_v61  ;;  %v1849_v1 = vpop.f32.mrb[10].mxu1  ;;  %v4248_v63 = vld [vmem:[%s5851_s10 + $0x90] ss:$8 sps:$4 sm:$0xff]  }
 0x391   : > { %v1851_v2 = vpop.f32.mrb[11].mxu1  ;;  %v1850_v40 = vadd.f32 %v1849_v1, %v1644_v23  ;;  %v4251_v1 = vld [vmem:[%s5851_s10 + $0xa0] ss:$8 sps:$4 sm:$0xff]   ;;  %v4301_v23 = vld [vmem:[%s5853_s12 + $0x11c] ss:$28 sps:$4 sm:$0xff]  }
 0x392   : > { %v1856_v3 = vand.u32 2147483647, %v1848_v0  ;;  %v1852_v4 = vadd.f32 %v1851_v2, %v1648_v61  ;;  %v1854_v15 = vmax.f32 %v1848_v0, 0.0  ;;  %v4245_v61 = vld [vmem:[%s5851_s10 + $0x80] ss:$8 sps:$4 sm:$0xff]  }
 0x393   : > { %v4253_v0 = vld [vmem:[%s5851_s10 + $0xa4] ss:$8 sps:$4 sm:$0xff]   ;;  %v4256_v2 = vld [vmem:[%s5851_s10 + $0xb4] ss:$8 sps:$4 sm:$0xff]  }
 0x394   : > { %v1858_v5 = vsub.f32 0.0, %v1856_v3  ;;  %v1857_v6 = vand.u32 2147483647, %v1852_v4  ;;  %v1855_v19 = vmax.f32 %v1852_v4, 0.0  ;;  %v4254_v3 = vld [vmem:[%s5851_s10 + $0xb0] ss:$8 sps:$4 sm:$0xff]  }
 0x395   : > { %v4259_v4 = vld [vmem:[%s5851_s10 + $0xc4] ss:$8 sps:$4 sm:$0xff]  }
 0x396   : > { %v1860_v7 = vmul.f32 1.442695, %v1858_v5  ;;  %v1859_v8 = vsub.f32 0.0, %v1857_v6  ;;  %v4257_v5 = vld [vmem:[%s5851_s10 + $0xc0] ss:$8 sps:$4 sm:$0xff]  }
 0x397   : > { %v4262_v6 = vld [vmem:[%s5851_s10 + $0xd4] ss:$8 sps:$4 sm:$0xff]  }
 0x398   : > { %4429 = vpow2.f32 %v1860_v7  ;;  %v1862_v9 = vmul.f32 1.442695, %v1859_v8  ;;  %v4260_v7 = vld [vmem:[%s5851_s10 + $0xd0] ss:$8 sps:$4 sm:$0xff]   ;;  %v4265_v8 = vld [vmem:[%s5851_s10 + $0xe4] ss:$8 sps:$4 sm:$0xff]  }
 0x39a   : > { %4431 = vpow2.f32 %v1862_v9  ;;  %v4263_v9 = vld [vmem:[%s5851_s10 + $0xe0] ss:$8 sps:$4 sm:$0xff]  }
 0x3a2   : > { %v4430_v10 = vpop.eup %4429 }
 0x3a3   : > { %v1864_v11 = vadd.f32 1.0, %v4430_v10  ;;  %v4268_v10 = vld [vmem:[%s5851_s10 + $0xf4] ss:$8 sps:$4 sm:$0xff]  }
 0x3a4   : > { %v4432_v12 = vpop.eup %4431 }
 0x3a5   : > { %4433 = vlog2.f32 %v1864_v11  ;;  %v1865_v13 = vadd.f32 1.0, %v4432_v12  ;;  %v4266_v11 = vld [vmem:[%s5851_s10 + $0xf0] ss:$8 sps:$4 sm:$0xff]   ;;  %v4269_v12 = vld [vmem:[%s5853_s12] ss:$28 sps:$4 sm:$0xff]  }
 0x3a7   : > { %4435 = vlog2.f32 %v1865_v13  ;;  %v4271_v13 = vld [vmem:[%s5853_s12 + $0x4] ss:$28 sps:$4 sm:$0xff]  }
 0x3a8   : > { %3046 = vmatprep.subr.bf16.mxu0 %v4271_v13  ;;  %v4320_v13 = vld [vmem:[%s5853_s12 + $0x1c8] ss:$28 sps:$4 sm:$0xff]  }
 0x3a9   : > { %3047 = vmatpush1.bf16.msra.mxu0 %v4269_v12  ;;  %v4322_v12 = vld [vmem:[%s5853_s12 + $0x1cc] ss:$28 sps:$4 sm:$0xff]  }
 0x3af   : > { %v4434_v14 = vpop.eup %4433 }
 0x3b0   : > { %v1867_v16 = vmul.f32 0.6931472, %v4434_v14  ;;  %v4274_v14 = vld [vmem:[%s5853_s12 + $0xc] ss:$28 sps:$4 sm:$0xff]  }
 0x3b1   : > { %v4436_v17 = vpop.eup %4435 }
 0x3b2   : > { %v1870_v18 = vadd.f32 %v1867_v16, %v1854_v15  ;;  %v1869_v20 = vmul.f32 0.6931472, %v4436_v17  ;;  %v4277_v15 = vld [vmem:[%s5853_s12 + $0x3c] ss:$28 sps:$4 sm:$0xff]   ;;  %v4283_v17 = vld [vmem:[%s5853_s12 + $0x74] ss:$28 sps:$4 sm:$0xff]  }
 0x3b3   : > { %v4275_v16 = vld [vmem:[%s5853_s12 + $0x38] ss:$28 sps:$4 sm:$0xff]   ;;  %3048 = vmatprep.subr.bf16.mxu0 %v4277_v15  ;;  %v4326_v15 = vld [vmem:[%s5853_s12 + $0x200] ss:$28 sps:$4 sm:$0xff]  }
 0x3b4   : > { %4437 = vrsqrt.f32 %v1870_v18  ;;  %v1871_v21 = vadd.f32 %v1869_v20, %v1855_v19  ;;  %vm1874_vm1 = vcmp.eq.f32.partialorder %v1870_v18, inf  ;;  %v1877_v26 = vand.u32 2147483648, %v1870_v18  ;;  %3049 = vmatpush1.bf16.msra.mxu0 %v4275_v16  ;;  %v4289_v19 = vld [vmem:[%s5853_s12 + $0xac] ss:$28 sps:$4 sm:$0xff]   ;;  %v4334_v16 = vld [vmem:[%s5853_s12 + $0x23c] ss:$28 sps:$4 sm:$0xff]  }
 0x3b5   : > { %vm1876_vm2 = vcmp.eq.f32.partialorder %v1870_v18, 0.0  ;;  %3050 = vmatprep.subr.bf16.mxu0 %v4283_v17  ;;  %v4287_v20 = vld [vmem:[%s5853_s12 + $0xa8] ss:$28 sps:$4 sm:$0xff]   ;;  %v4332_v17 = vld [vmem:[%s5853_s12 + $0x238] ss:$28 sps:$4 sm:$0xff]  }
 0x3b6   : > { %4439 = vrsqrt.f32 %v1871_v21  ;;  %vm1881_vm3 = vcmp.eq.f32.partialorder %v1871_v21, inf  ;;  %v1884_v33 = vand.u32 2147483648, %v1871_v21  ;;  %vm1883_vm4 = vcmp.eq.f32.partialorder %v1871_v21, 0.0 }
 0x3be   : > { %v4438_v22 = vpop.eup %4437 }
 0x3bf   : > { %v1873_v24 = vmul.f32 %v4438_v22, %v1870_v18  ;;  %v4293_v22 = vld [vmem:[%s5853_s12 + $0xe0] ss:$28 sps:$4 sm:$0xff]  }
 0x3c0   : > { %v4440_v25 = vpop.eup %4439 }
 0x3c1   : > { %v1875_v28 = vsel %vm1874_vm1, %v1870_v18, %v1873_v24  ;;  %v1880_v29 = vmul.f32 %v4440_v25, %v1871_v21  ;;  %v4281_v18 = vld [vmem:[%s5853_s12 + $0x70] ss:$28 sps:$4 sm:$0xff]   ;;  %v4299_v24 = vld [vmem:[%s5853_s12 + $0x118] ss:$28 sps:$4 sm:$0xff]  }
 0x3c2   : > { %v1878_v30 = vsel %vm1876_vm2, %v1877_v26, %v1875_v28  ;;  %3051 = vmatpush1.bf16.msra.mxu0 %v4281_v18  ;;  %v4307_v25 = vld [vmem:[%s5853_s12 + $0x154] ss:$28 sps:$4 sm:$0xff]   ;;  %v4311_v28 = vld [vmem:[%s5853_s12 + $0x188] ss:$28 sps:$4 sm:$0xff]  }
 0x3c3   : > { %v1882_v37 = vsel %vm1881_vm3, %v1871_v21, %v1880_v29  ;;  %v1888_v38 = vmul.f32 %v1886_v27, %v1878_v30  ;;  %3052 = vmatprep.subr.bf16.mxu0 %v4289_v19  ;;  %v4295_v21 = vld [vmem:[%s5853_s12 + $0xe4] ss:$28 sps:$4 sm:$0xff]   ;;  %v4305_v26 = vld [vmem:[%s5853_s12 + $0x150] ss:$28 sps:$4 sm:$0xff]  }
 0x3c4   : > { %v1885_v39 = vsel %vm1883_vm4, %v1884_v33, %v1882_v37  ;;  %v4313_v27 = vld [vmem:[%s5853_s12 + $0x18c] ss:$28 sps:$4 sm:$0xff]   ;;  %v4319_v29 = vld [vmem:[%s5853_s12 + $0x1c4] ss:$28 sps:$4 sm:$0xff]   ;;  %v4325_v33 = vld [vmem:[%s5853_s12 + $0x1fc] ss:$28 sps:$4 sm:$0xff]  }
 0x3c5   : > { %v1889_v41 = vmul.f32 %v1887_v35, %v1885_v39  ;;  %v1890_v42 = vadd.f32 %v1888_v38, %v1846_v36  ;;  %v4317_v30 = vld [vmem:[%s5853_s12 + $0x1c0] ss:$28 sps:$4 sm:$0xff]   ;;  %v4323_v35 = vld [vmem:[%s5853_s12 + $0x1f8] ss:$28 sps:$4 sm:$0xff]   ;;  %v4329_v37 = vld [vmem:[%s5853_s12 + $0x230] ss:$28 sps:$4 sm:$0xff]  }
 0x3c6   : > { %3053 = vmatpush1.bf16.msra.mxu0 %v4287_v20  ;;  %v4331_v36 = vld [vmem:[%s5853_s12 + $0x234] ss:$28 sps:$4 sm:$0xff]   ;;  %v4337_v38 = vld [vmem:[%s5853_s12 + $0x26c] ss:$28 sps:$4 sm:$0xff]  }
 0x3c7   : > { %v1891_v43 = vadd.f32 %v1889_v41, %v1850_v40  ;;  %1892 = vst.msk [vmem:[%s548_s27] sm:$0xff] %vm1172_vm0, %v1890_v42  ;;  %3054 = vmatprep.subr.bf16.mxu0 %v4295_v21  ;;  %v4335_v39 = vld [vmem:[%s5853_s12 + $0x268] ss:$28 sps:$4 sm:$0xff]   ;;  %v4341_v41 = vld [vmem:[%s5853_s12 + $0x2a0] ss:$28 sps:$4 sm:$0xff]  }
 0x3c8   : > { %v4343_v40 = vld [vmem:[%s5853_s12 + $0x2a4] ss:$28 sps:$4 sm:$0xff]   ;;  %v4340_v18 = vld [vmem:[%s5853_s12 + $0x274] ss:$28 sps:$4 sm:$0xff]   ;;  %v4346_v20 = vld [vmem:[%s5853_s12 + $0x2ac] ss:$28 sps:$4 sm:$0xff]  }
 0x3c9   : > { %1893 = vst.msk [vmem:[%s548_s27 + $0x8] sm:$0xff] %vm1172_vm0, %v1891_v43  ;;  %v1894_v46 = vpack.c.bf16 %v1891_v43, %v1890_v42  ;;  %v4349_v42 = vld [vmem:[%s5853_s12 + $0x2dc] ss:$28 sps:$4 sm:$0xff]   ;;  %v4338_v19 = vld [vmem:[%s5853_s12 + $0x270] ss:$28 sps:$4 sm:$0xff]   ;;  %s5795_s27 = scalar_lea.hbm %s5855_s14, %s3898_s18 }
 0x3ca   : > { %3055 = vmatpush1.bf16.msra.mxu0 %v4293_v22  ;;  %v4347_v43 = vld [vmem:[%s5853_s12 + $0x2d8] ss:$28 sps:$4 sm:$0xff]   ;;  %v4344_v21 = vld [vmem:[%s5853_s12 + $0x2a8] ss:$28 sps:$4 sm:$0xff]  }
 0x3cb   : > { %2036 = vmatmul.mubr.bf16.vlgmr.msra.gmra.mrb[12].mxu1 %v1894_v46  ;;  %3056 = vmatprep.subr.bf16.mxu0 %v4301_v23  ;;  %v4352_v22 = vld [vmem:[%s5853_s12 + $0x2e4] ss:$28 sps:$4 sm:$0xff]  }
 0x3cc   : > { %2257 = vmatpush1.bf16.msra.mxu1 %v4221_v45  ;;  %v1911_v45 = vld [vmem:[%s5850_s9] sm:$0x3] }
 0x3cd   : > { %2258 = vmatprep.subr.bf16.mxu1 %v4226_v47  ;;  %v1916_v46 = vrot.slane %v1911_v45, %v5184_v32  ;;  %v1920_v47 = vrot.slane %v1911_v45, %v5190_v34  ;;  %v4350_v23 = vld [vmem:[%s5853_s12 + $0x2e0] ss:$28 sps:$4 sm:$0xff]  }
 0x3ce   : > { %3057 = vmatpush1.bf16.msra.mxu0 %v4299_v24  ;;  %v4355_v24 = vld [vmem:[%s5853_s12 + $0x314] ss:$28 sps:$4 sm:$0xff]  }
 0x3cf   : > { %3058 = vmatprep.subr.bf16.mxu0 %v4307_v25  ;;  %v4358_v25 = vld [vmem:[%s5853_s12 + $0x31c] ss:$28 sps:$4 sm:$0xff]  }
 0x3d0   : > { %2259 = vmatpush1.bf16.msra.mxu1 %v4224_v48 }
 0x3d1   : > { %2260 = vmatprep.subr.bf16.mxu1 %v4229_v49 }
 0x3d2   : > { %3059 = vmatpush1.bf16.msra.mxu0 %v4305_v26  ;;  %v4353_v26 = vld [vmem:[%s5853_s12 + $0x310] ss:$28 sps:$4 sm:$0xff]  }
 0x3d3   : > { %3060 = vmatprep.subr.bf16.mxu0 %v4313_v27  ;;  %v4356_v27 = vld [vmem:[%s5853_s12 + $0x318] ss:$28 sps:$4 sm:$0xff]  }
 0x3d4   : > { %2261 = vmatpush1.bf16.msra.mxu1 %v4227_v50 }
 0x3d5   : > { %2262 = vmatprep.subr.bf16.mxu1 %v4232_v51 }
 0x3d6   : > { %3061 = vmatpush1.bf16.msra.mxu0 %v4311_v28  ;;  %v4361_v28 = vld [vmem:[%s5853_s12 + $0x34c] ss:$28 sps:$4 sm:$0xff]  }
 0x3d7   : > { %3062 = vmatprep.subr.bf16.mxu0 %v4319_v29  ;;  %v4364_v29 = vld [vmem:[%s5853_s12 + $0x354] ss:$28 sps:$4 sm:$0xff]  }
 0x3d8   : > { %2263 = vmatpush1.bf16.msra.mxu1 %v4230_v52 }
 0x3d9   : > { %2264 = vmatprep.subr.bf16.mxu1 %v4235_v53 }
 0x3da   : > { %3063 = vmatpush1.bf16.msra.mxu0 %v4317_v30  ;;  %v4359_v30 = vld [vmem:[%s5853_s12 + $0x348] ss:$28 sps:$4 sm:$0xff]  }
 0x3db   : > { %3064 = vmatprep.subr.bf16.mxu0 %v4325_v33  ;;  %v4362_v33 = vld [vmem:[%s5853_s12 + $0x350] ss:$28 sps:$4 sm:$0xff]  }
 0x3dc   : > { %2265 = vmatpush1.bf16.msra.mxu1 %v4233_v44 }
 0x3dd   : > { %2266 = vmatprep.subr.bf16.mxu1 %v4238_v54 }
 0x3de   : > { %3065 = vmatpush1.bf16.msra.mxu0 %v4323_v35  ;;  %v4367_v35 = vld [vmem:[%s5853_s12 + $0x14] ss:$28 sps:$4 sm:$0xff]  }
 0x3df   : > { %3066 = vmatprep.subr.bf16.mxu0 %v4331_v36  ;;  %v4368_v36 = vld [vmem:[%s5853_s12 + $0x1d8] ss:$28 sps:$4 sm:$0xff]  }
 0x3e0   : > { %2267 = vmatpush1.bf16.msra.mxu1 %v4236_v55 }
 0x3e1   : > { %2268 = vmatprep.subr.bf16.mxu1 %v4241_v56 }
 0x3e2   : > { %3067 = vmatpush1.bf16.msra.mxu0 %v4329_v37  ;;  %v2084_v37 = vld [vmem:[%s5852_s11] sm:$0x3] }
 0x3e3   : > { %3068 = vmatprep.subr.bf16.mxu0 %v4337_v38  ;;  %v2089_v38 = vrot.slane %v2084_v37, %v5184_v32 }
 0x3e4   : > { %2269 = vmatpush1.bf16.msra.mxu1 %v4239_v57 }
 0x3e5   : > { %2270 = vmatprep.subr.bf16.mxu1 %v4244_v58 }
 0x3e6   : > { %3069 = vmatpush1.bf16.msra.mxu0 %v4335_v39  ;;  %v2093_v39 = vrot.slane %v2084_v37, %v5190_v34  ;;  %v4428_v37 = vld [vmem:[%s5853_s12 + $0x35c] ss:$28 sps:$4 sm:$0xff]  }
 0x3e7   : > { %3070 = vmatprep.subr.bf16.mxu0 %v4343_v40 }
 0x3e8   : > { %2271 = vmatpush1.bf16.msra.mxu1 %v4242_v59 }
 0x3e9   : > { %2272 = vmatprep.subr.bf16.mxu1 %v4247_v60 }
 0x3ea   : > { %3071 = vmatpush1.bf16.msra.mxu0 %v4341_v41 }
 0x3eb   : > { %3072 = vmatprep.subr.bf16.mxu0 %v4349_v42 }
 0x3ec   : > { %2273 = vmatpush1.bf16.msra.mxu1 %v4245_v61  ;;  %v4272_v61 = vld [vmem:[%s5853_s12 + $0x8] ss:$28 sps:$4 sm:$0xff]  }
 0x3ed   : > { %2274 = vmatprep.subr.bf16.mxu1 %v4250_v62  ;;  %v4280_v62 = vld [vmem:[%s5853_s12 + $0x44] ss:$28 sps:$4 sm:$0xff]  }
 0x3ee   : > { %3073 = vmatpush1.bf16.msra.mxu0 %v4347_v43 }
 0x3ef   : > { %3074 = vmatprep.subr.bf16.mxu0 %v4355_v24  ;;  %v4413_v24 = vld [vmem:[%s5853_s12 + $0x244] ss:$28 sps:$4 sm:$0xff]  }
 0x3f0   : > { %2275 = vmatpush1.bf16.msra.mxu1 %v4248_v63  ;;  %v4278_v63 = vld [vmem:[%s5853_s12 + $0x40] ss:$28 sps:$4 sm:$0xff]  }
 0x3f1   : > { %2276 = vmatprep.subr.bf16.mxu1 %v4253_v0  ;;  %v4286_v0 = vld [vmem:[%s5853_s12 + $0x7c] ss:$28 sps:$4 sm:$0xff]  }
 0x3f2   : > { %3075 = vmatpush1.bf16.msra.mxu0 %v4353_v26  ;;  %v4416_v26 = vld [vmem:[%s5853_s12 + $0x27c] ss:$28 sps:$4 sm:$0xff]  }
 0x3f3   : > { %3076 = vmatprep.subr.bf16.mxu0 %v4361_v28  ;;  %v4419_v28 = vld [vmem:[%s5853_s12 + $0x2b4] ss:$28 sps:$4 sm:$0xff]  }
 0x3f4   : > { %2277 = vmatpush1.bf16.msra.mxu1 %v4251_v1  ;;  %v4284_v1 = vld [vmem:[%s5853_s12 + $0x78] ss:$28 sps:$4 sm:$0xff]  }
 0x3f5   : > { %2278 = vmatprep.subr.bf16.mxu1 %v4256_v2  ;;  %v4292_v2 = vld [vmem:[%s5853_s12 + $0xb4] ss:$28 sps:$4 sm:$0xff]  }
 0x3f6   : > { %3077 = vmatpush1.bf16.msra.mxu0 %v4359_v30  ;;  %v4422_v30 = vld [vmem:[%s5853_s12 + $0x2ec] ss:$28 sps:$4 sm:$0xff]  }
 0x3f7   : > { %3132 = vmatprep.subr.bf16.mxu0 %v4367_v35  ;;  %v4425_v35 = vld [vmem:[%s5853_s12 + $0x324] ss:$28 sps:$4 sm:$0xff]  }
 0x3f8   : > { %2279 = vmatpush1.bf16.msra.mxu1 %v4254_v3  ;;  %v4290_v3 = vld [vmem:[%s5853_s12 + $0xb0] ss:$28 sps:$4 sm:$0xff]  }
 0x3f9   : > { %2280 = vmatprep.subr.bf16.mxu1 %v4259_v4  ;;  %v4298_v4 = vld [vmem:[%s5853_s12 + $0xec] ss:$28 sps:$4 sm:$0xff]  }
 0x3fc   : > { %2281 = vmatpush1.bf16.msra.mxu1 %v4257_v5  ;;  %v4296_v5 = vld [vmem:[%s5853_s12 + $0xe8] ss:$28 sps:$4 sm:$0xff]  }
 0x3fd   : > { %2282 = vmatprep.subr.bf16.mxu1 %v4262_v6  ;;  %v4304_v6 = vld [vmem:[%s5853_s12 + $0x124] ss:$28 sps:$4 sm:$0xff]  }
 0x400   : > { %2283 = vmatpush1.bf16.msra.mxu1 %v4260_v7  ;;  %v4302_v7 = vld [vmem:[%s5853_s12 + $0x120] ss:$28 sps:$4 sm:$0xff]  }
 0x401   : > { %2284 = vmatprep.subr.bf16.mxu1 %v4265_v8  ;;  %v4310_v8 = vld [vmem:[%s5853_s12 + $0x15c] ss:$28 sps:$4 sm:$0xff]  }
 0x404   : > { %2285 = vmatpush1.bf16.msra.mxu1 %v4263_v9  ;;  %v4308_v9 = vld [vmem:[%s5853_s12 + $0x158] ss:$28 sps:$4 sm:$0xff]  }
 0x405   : > { %2286 = vmatprep.subr.bf16.mxu1 %v4268_v10  ;;  %v4316_v10 = vld [vmem:[%s5853_s12 + $0x194] ss:$28 sps:$4 sm:$0xff]  }
 0x408   : > { %2287 = vmatpush1.bf16.msra.mxu1 %v4266_v11  ;;  %v4314_v11 = vld [vmem:[%s5853_s12 + $0x190] ss:$28 sps:$4 sm:$0xff]  }
 0x409   : > { %3089 = vmatprep.subr.bf16.mxu1 %v4274_v14  ;;  %v4328_v14 = vld [vmem:[%s5853_s12 + $0x204] ss:$28 sps:$4 sm:$0xff]  }
 0x49e   : > { %v2037_v48 = vpop.f32.mrb[12].mxu1 }
 0x49f   : > { %v2038_v49 = vadd.f32 %v2037_v48, %v1916_v46  ;;  %v2039_v50 = vpop.f32.mrb[13].mxu1 }
 0x4a0   : > { %v2040_v51 = vadd.f32 %v2039_v50, %v1920_v47  ;;  %v2041_v52 = vpop.f32.mrb[14].mxu1 }
 0x4a1   : > { %v2042_v53 = vadd.f32 %v2041_v52, %v1916_v46  ;;  %v2043_v44 = vpop.f32.mrb[15].mxu1  ;;  %v2046_v55 = vmax.f32 %v2038_v49, 0.0 }
 0x4a2   : > { %v2044_v54 = vadd.f32 %v2043_v44, %v1920_v47  ;;  %v2047_v57 = vmax.f32 %v2040_v51, 0.0 }
 0x4a3   : > { %v2048_v56 = vmax.f32 %v2042_v53, 0.0 }
 0x4a4   : > { %v2049_v58 = vmax.f32 %v2044_v54, 0.0  ;;  %v4365_v54 = vld [vmem:[%s5853_s12 + $0x10] ss:$28 sps:$4 sm:$0xff]  }
 0x4a5   : > { %v2050_v59 = vpack.c.bf16 %v2048_v56, %v2046_v55  ;;  %v4369_v55 = vld [vmem:[%s5853_s12 + $0x18] ss:$28 sps:$4 sm:$0xff]   ;;  %v4372_v56 = vld [vmem:[%s5853_s12 + $0x4c] ss:$28 sps:$4 sm:$0xff]  }
 0x4a6   : > { %v2051_v60 = vpack.c.bf16 %v2049_v58, %v2047_v57  ;;  %v4373_v57 = vld [vmem:[%s5853_s12 + $0x210] ss:$28 sps:$4 sm:$0xff]   ;;  %v4370_v58 = vld [vmem:[%s5853_s12 + $0x48] ss:$28 sps:$4 sm:$0xff]  }
 0x4a8   : > { %2288 = vmatprep.mubr.bf16.mxu1 %v2051_v60  ;;  %v4377_v60 = vld [vmem:[%s5853_s12 + $0x84] ss:$28 sps:$4 sm:$0xff]  }
 0x4a9   : > { %2289 = vmatmul.mubr.bf16.vlgmr.msra.gmra.mrb[16].mxu1 %v2050_v59  ;;  %v4374_v59 = vld [vmem:[%s5853_s12 + $0x50] ss:$28 sps:$4 sm:$0xff]  }
 0x4aa   : > { %3090 = vmatpush1.bf16.msra.mxu1 %v4272_v61  ;;  %v4378_v61 = vld [vmem:[%s5853_s12 + $0x248] ss:$28 sps:$4 sm:$0xff]  }
 0x4ab   : > { %3091 = vmatprep.subr.bf16.mxu1 %v4280_v62  ;;  %v4375_v62 = vld [vmem:[%s5853_s12 + $0x80] ss:$28 sps:$4 sm:$0xff]  }
 0x4ae   : > { %3092 = vmatpush1.bf16.msra.mxu1 %v4278_v63  ;;  %v4379_v63 = vld [vmem:[%s5853_s12 + $0x88] ss:$28 sps:$4 sm:$0xff]  }
 0x4af   : > { %3093 = vmatprep.subr.bf16.mxu1 %v4286_v0  ;;  %v4382_v0 = vld [vmem:[%s5853_s12 + $0xbc] ss:$28 sps:$4 sm:$0xff]  }
 0x4b2   : > { %3094 = vmatpush1.bf16.msra.mxu1 %v4284_v1  ;;  %v4383_v1 = vld [vmem:[%s5853_s12 + $0x280] ss:$28 sps:$4 sm:$0xff]  }
 0x4b3   : > { %3095 = vmatprep.subr.bf16.mxu1 %v4292_v2  ;;  %v4380_v2 = vld [vmem:[%s5853_s12 + $0xb8] ss:$28 sps:$4 sm:$0xff]  }
 0x4b6   : > { %3096 = vmatpush1.bf16.msra.mxu1 %v4290_v3  ;;  %v4384_v3 = vld [vmem:[%s5853_s12 + $0xc0] ss:$28 sps:$4 sm:$0xff]  }
 0x4b7   : > { %3097 = vmatprep.subr.bf16.mxu1 %v4298_v4  ;;  %v4387_v4 = vld [vmem:[%s5853_s12 + $0xf4] ss:$28 sps:$4 sm:$0xff]  }
 0x4ba   : > { %3098 = vmatpush1.bf16.msra.mxu1 %v4296_v5  ;;  %v4388_v5 = vld [vmem:[%s5853_s12 + $0x2b8] ss:$28 sps:$4 sm:$0xff]  }
 0x4bb   : > { %3099 = vmatprep.subr.bf16.mxu1 %v4304_v6  ;;  %v4385_v6 = vld [vmem:[%s5853_s12 + $0xf0] ss:$28 sps:$4 sm:$0xff]  }
 0x4be   : > { %3100 = vmatpush1.bf16.msra.mxu1 %v4302_v7  ;;  %v4389_v7 = vld [vmem:[%s5853_s12 + $0xf8] ss:$28 sps:$4 sm:$0xff]  }
 0x4bf   : > { %3101 = vmatprep.subr.bf16.mxu1 %v4310_v8  ;;  %v4392_v8 = vld [vmem:[%s5853_s12 + $0x12c] ss:$28 sps:$4 sm:$0xff]  }
 0x4c2   : > { %3102 = vmatpush1.bf16.msra.mxu1 %v4308_v9  ;;  %v4393_v9 = vld [vmem:[%s5853_s12 + $0x2f0] ss:$28 sps:$4 sm:$0xff]  }
 0x4c3   : > { %3103 = vmatprep.subr.bf16.mxu1 %v4316_v10  ;;  %v4390_v10 = vld [vmem:[%s5853_s12 + $0x128] ss:$28 sps:$4 sm:$0xff]  }
 0x4c6   : > { %3104 = vmatpush1.bf16.msra.mxu1 %v4314_v11  ;;  %v4394_v11 = vld [vmem:[%s5853_s12 + $0x130] ss:$28 sps:$4 sm:$0xff]  }
 0x4c7   : > { %3105 = vmatprep.subr.bf16.mxu1 %v4322_v12  ;;  %v4397_v12 = vld [vmem:[%s5853_s12 + $0x164] ss:$28 sps:$4 sm:$0xff]  }
 0x4ca   : > { %3106 = vmatpush1.bf16.msra.mxu1 %v4320_v13  ;;  %v4398_v13 = vld [vmem:[%s5853_s12 + $0x328] ss:$28 sps:$4 sm:$0xff]  }
 0x4cb   : > { %3107 = vmatprep.subr.bf16.mxu1 %v4328_v14  ;;  %v4395_v14 = vld [vmem:[%s5853_s12 + $0x160] ss:$28 sps:$4 sm:$0xff]  }
 0x4ce   : > { %3108 = vmatpush1.bf16.msra.mxu1 %v4326_v15  ;;  %v4399_v15 = vld [vmem:[%s5853_s12 + $0x168] ss:$28 sps:$4 sm:$0xff]  }
 0x4cf   : > { %3109 = vmatprep.subr.bf16.mxu1 %v4334_v16  ;;  %v4402_v16 = vld [vmem:[%s5853_s12 + $0x19c] ss:$28 sps:$4 sm:$0xff]  }
 0x4d2   : > { %3110 = vmatpush1.bf16.msra.mxu1 %v4332_v17  ;;  %v4403_v17 = vld [vmem:[%s5853_s12 + $0x360] ss:$28 sps:$4 sm:$0xff]  }
 0x4d3   : > { %3111 = vmatprep.subr.bf16.mxu1 %v4340_v18  ;;  %v4400_v18 = vld [vmem:[%s5853_s12 + $0x198] ss:$28 sps:$4 sm:$0xff]  }
 0x4d6   : > { %3112 = vmatpush1.bf16.msra.mxu1 %v4338_v19  ;;  %v4404_v19 = vld [vmem:[%s5853_s12 + $0x1a0] ss:$28 sps:$4 sm:$0xff]  }
 0x4d7   : > { %3113 = vmatprep.subr.bf16.mxu1 %v4346_v20  ;;  %v4407_v20 = vld [vmem:[%s5853_s12 + $0x1d4] ss:$28 sps:$4 sm:$0xff]  }
 0x4da   : > { %3114 = vmatpush1.bf16.msra.mxu1 %v4344_v21  ;;  %v4405_v21 = vld [vmem:[%s5853_s12 + $0x1d0] ss:$28 sps:$4 sm:$0xff]  }
 0x4db   : > { %3115 = vmatprep.subr.bf16.mxu1 %v4352_v22  ;;  %v4410_v22 = vld [vmem:[%s5853_s12 + $0x20c] ss:$28 sps:$4 sm:$0xff]  }
 0x4de   : > { %3116 = vmatpush1.bf16.msra.mxu1 %v4350_v23  ;;  %v4408_v23 = vld [vmem:[%s5853_s12 + $0x208] ss:$28 sps:$4 sm:$0xff]  }
 0x4df   : > { %3117 = vmatprep.subr.bf16.mxu1 %v4358_v25  ;;  %v4411_v25 = vld [vmem:[%s5853_s12 + $0x240] ss:$28 sps:$4 sm:$0xff]  }
 0x4e2   : > { %3118 = vmatpush1.bf16.msra.mxu1 %v4356_v27  ;;  %v4414_v27 = vld [vmem:[%s5853_s12 + $0x278] ss:$28 sps:$4 sm:$0xff]  }
 0x4e3   : > { %3119 = vmatprep.subr.bf16.mxu1 %v4364_v29  ;;  %v4417_v29 = vld [vmem:[%s5853_s12 + $0x2b0] ss:$28 sps:$4 sm:$0xff]  }
 0x4e6   : > { %3120 = vmatpush1.bf16.msra.mxu1 %v4362_v33  ;;  %v4420_v33 = vld [vmem:[%s5853_s12 + $0x2e8] ss:$28 sps:$4 sm:$0xff]  }
 0x4e7   : > { %3858 = vmatprep.subr.bf16.mxu1 %v4368_v36  ;;  %v4423_v36 = vld [vmem:[%s5853_s12 + $0x320] ss:$28 sps:$4 sm:$0xff]  }
 0x57c   : > { %v2290_v40 = vpop.f32.mrb[16].mxu1 }
 0x57d   : > { %v2291_v41 = vadd.f32 %v2290_v40, %v2089_v38  ;;  %v2292_v42 = vpop.f32.mrb[17].mxu1  ;;  %v5759_v40 = vld [vmem:[%s5854_s13] sm:$0x7f] }
 0x57e   : > { %v2293_v43 = vadd.f32 %v2292_v42, %v2093_v39  ;;  %v2294_v45 = vpop.f32.mrb[18].mxu1  ;;  %v2438_v42 = vrot.slane %v5759_v40, %v5184_v32 }
 0x57f   : > { %v2295_v46 = vadd.f32 %v2294_v45, %v2089_v38  ;;  %v2296_v47 = vpop.f32.mrb[19].mxu1  ;;  %v2299_v49 = vmax.f32 %v2291_v41, 0.0  ;;  %v4426_v38 = vld [vmem:[%s5853_s12 + $0x358] ss:$28 sps:$4 sm:$0xff]   ;;  %v2449_v41 = vsub.s32 3, %v5181_v31  ;;  %v2442_v45 = vrot.slane %v5759_v40, %v5190_v34 }
 0x580   : > { %v2297_v48 = vadd.f32 %v2296_v47, %v2093_v39  ;;  %v2300_v51 = vmax.f32 %v2293_v43, 0.0  ;;  %v2445_v39 = vsub.s32 2, %v5181_v31 }
 0x581   : > { %v2301_v50 = vmax.f32 %v2295_v46, 0.0  ;;  %v2450_v46 = vrot.slane %v5759_v40, %v2449_v41 }
 0x582   : > { %v2302_v52 = vmax.f32 %v2297_v48, 0.0  ;;  %v2446_v43 = vrot.slane %v5759_v40, %v2445_v39 }
 0x583   : > { %v5611_v53 = vpack.c.bf16 %v2301_v50, %v2299_v49 }
 0x584   : > { %v2304_v44 = vpack.c.bf16 %v2302_v52, %v2300_v51 }
 0x586   : > { %3078 = vmatprep.mubr.bf16.mxu0 %v2304_v44  ;;  %3121 = vmatprep.mubr.bf16.mxu1 %v2304_v44 }
 0x587   : > { %3079 = vmatmul.mubr.bf16.vlgmr.msra.gmra.mrb[4].mxu0 %v5611_v53  ;;  %3122 = vmatmul.mubr.bf16.vlgmr.msra.gmra.mrb[20].mxu1 %v5611_v53 }
 0x588   : > { %3133 = vmatpush1.bf16.msra.mxu0 %v4365_v54  ;;  %3859 = vmatpush3.bf16.msra.mxu1 %v4369_v55 }
 0x589   : > { %3164 = vmatprep.mubr.bf16.mxu0 %v2304_v44  ;;  %3207 = vmatprep.mubr.bf16.mxu1 %v2304_v44 }
 0x58a   : > { %3134 = vmatprep.subr.bf16.mxu0 %v4372_v56  ;;  %3860 = vmatprep.subr.bf16.mxu1 %v4373_v57 }
 0x58c   : > { %3135 = vmatpush1.bf16.msra.mxu0 %v4370_v58  ;;  %3861 = vmatpush3.bf16.msra.mxu1 %v4374_v59 }
 0x58d   : > { %3136 = vmatprep.subr.bf16.mxu0 %v4377_v60  ;;  %3862 = vmatprep.subr.bf16.mxu1 %v4378_v61 }
 0x590   : > { %3137 = vmatpush1.bf16.msra.mxu0 %v4375_v62  ;;  %3863 = vmatpush3.bf16.msra.mxu1 %v4379_v63 }
 0x591   : > { %3138 = vmatprep.subr.bf16.mxu0 %v4382_v0  ;;  %3864 = vmatprep.subr.bf16.mxu1 %v4383_v1 }
 0x594   : > { %3139 = vmatpush1.bf16.msra.mxu0 %v4380_v2  ;;  %3865 = vmatpush3.bf16.msra.mxu1 %v4384_v3 }
 0x595   : > { %3140 = vmatprep.subr.bf16.mxu0 %v4387_v4  ;;  %3866 = vmatprep.subr.bf16.mxu1 %v4388_v5 }
 0x598   : > { %3141 = vmatpush1.bf16.msra.mxu0 %v4385_v6  ;;  %3867 = vmatpush3.bf16.msra.mxu1 %v4389_v7 }
 0x599   : > { %3142 = vmatprep.subr.bf16.mxu0 %v4392_v8  ;;  %3868 = vmatprep.subr.bf16.mxu1 %v4393_v9 }
 0x59c   : > { %3143 = vmatpush1.bf16.msra.mxu0 %v4390_v10  ;;  %3869 = vmatpush3.bf16.msra.mxu1 %v4394_v11 }
 0x59d   : > { %3144 = vmatprep.subr.bf16.mxu0 %v4397_v12  ;;  %3870 = vmatprep.subr.bf16.mxu1 %v4398_v13 }
 0x5a0   : > { %3145 = vmatpush1.bf16.msra.mxu0 %v4395_v14  ;;  %3871 = vmatpush3.bf16.msra.mxu1 %v4399_v15 }
 0x5a1   : > { %3146 = vmatprep.subr.bf16.mxu0 %v4402_v16  ;;  %3872 = vmatprep.subr.bf16.mxu1 %v4403_v17 }
 0x5a4   : > { %3147 = vmatpush1.bf16.msra.mxu0 %v4400_v18  ;;  %3873 = vmatpush3.bf16.msra.mxu1 %v4404_v19 }
 0x5a5   : > { %3148 = vmatprep.subr.bf16.mxu0 %v4407_v20 }
 0x5a7   : > { %3208 = vmatmul.mubr.bf16.vlgmr.msra.gmra.mrb[24].mxu1 %v5611_v53 }
 0x5a8   : > { %3149 = vmatpush1.bf16.msra.mxu0 %v4405_v21 }
 0x5a9   : > { %3150 = vmatprep.subr.bf16.mxu0 %v4410_v22 }
 0x5ac   : > { %3151 = vmatpush1.bf16.msra.mxu0 %v4408_v23 }
 0x5ad   : > { %3152 = vmatprep.subr.bf16.mxu0 %v4413_v24 }
 0x5b0   : > { %3153 = vmatpush1.bf16.msra.mxu0 %v4411_v25 }
 0x5b1   : > { %3154 = vmatprep.subr.bf16.mxu0 %v4416_v26 }
 0x5b4   : > { %3155 = vmatpush1.bf16.msra.mxu0 %v4414_v27 }
 0x5b5   : > { %3156 = vmatprep.subr.bf16.mxu0 %v4419_v28  ;;  %v2461_v28 = vsub.s32 6, %v5181_v31 }
 0x5b8   : > { %3157 = vmatpush1.bf16.msra.mxu0 %v4417_v29 }
 0x5b9   : > { %3158 = vmatprep.subr.bf16.mxu0 %v4422_v30 }
 0x5bc   : > { %3159 = vmatpush1.bf16.msra.mxu0 %v4420_v33 }
 0x5bd   : > { %3160 = vmatprep.subr.bf16.mxu0 %v4425_v35 }
 0x5c0   : > { %3161 = vmatpush1.bf16.msra.mxu0 %v4423_v36 }
 0x5c1   : > { %3162 = vmatprep.subr.bf16.mxu0 %v4428_v37 }
 0x5c4   : > { %3163 = vmatpush1.bf16.msra.mxu0 %v4426_v38  ;;  %v2462_v38 = vrot.slane %v5759_v40, %v2461_v28 }
 0x5c7   : > { %3165 = vmatmul.mubr.bf16.vlgmr.msra.gmra.mrb[8].mxu0 %v5611_v53 }
 0x65a   : > { %v3080_v47 = vpop.f32.mrb[4].mxu0  ;;  %v3123_v48 = vpop.f32.mrb[20].mxu1 }
 0x65b   : > { %v3081_v49 = vadd.f32 %v3080_v47, %v2438_v42  ;;  %v3124_v50 = vadd.f32 %v3123_v48, %v2446_v43  ;;  %v3082_v51 = vpop.f32.mrb[5].mxu0  ;;  %v3125_v52 = vpop.f32.mrb[21].mxu1 }
 0x65c   : > { %v3083_v53 = vadd.f32 %v3082_v51, %v2442_v45  ;;  %v3126_v44 = vadd.f32 %v3125_v52, %v2450_v46  ;;  %v3084_v54 = vpop.f32.mrb[6].mxu0  ;;  %v3127_v55 = vpop.f32.mrb[22].mxu1 }
 0x65d   : > { %v3216_v56 = vsub.f32 0.0, %v3081_v49  ;;  %v3218_v57 = vsub.f32 0.0, %v3124_v50  ;;  %v3085_v32 = vadd.f32 %v3084_v54, %v2438_v42  ;;  %v3128_v58 = vadd.f32 %v3127_v55, %v2446_v43  ;;  %v3086_v59 = vpop.f32.mrb[7].mxu0  ;;  %v3129_v60 = vpop.f32.mrb[23].mxu1 }
 0x65e   : > { %v3217_v61 = vsub.f32 0.0, %v3083_v53  ;;  %v3219_v34 = vsub.f32 0.0, %v3126_v44  ;;  %v3087_v62 = vadd.f32 %v3086_v59, %v2442_v45  ;;  %v3130_v63 = vadd.f32 %v3129_v60, %v2450_v46 }
 0x65f   : > { %v3230_v0 = vmul.f32 1.442695, %v3216_v56  ;;  %v3234_v1 = vmul.f32 1.442695, %v3218_v57  ;;  %v3223_v2 = vsub.f32 0.0, %v3085_v32  ;;  %v3225_v3 = vsub.f32 0.0, %v3128_v58 }
 0x660   : > { %v3232_v4 = vmul.f32 1.442695, %v3217_v61  ;;  %v3236_v5 = vmul.f32 1.442695, %v3219_v34  ;;  %v3224_v6 = vsub.f32 0.0, %v3087_v62  ;;  %v3226_v7 = vsub.f32 0.0, %v3130_v63 }
 0x661   : > { %4441 = vpow2.f32 %v3230_v0  ;;  %v3244_v8 = vmul.f32 1.442695, %v3223_v2  ;;  %v3248_v9 = vmul.f32 1.442695, %v3225_v3 }
 0x662   : > { %4443 = vpow2.f32 %v3234_v1  ;;  %v3246_v10 = vmul.f32 1.442695, %v3224_v6  ;;  %v3250_v11 = vmul.f32 1.442695, %v3226_v7 }
 0x663   : > { %4445 = vpow2.f32 %v3232_v4 }
 0x664   : > { %4447 = vpow2.f32 %v3236_v5 }
 0x665   : > { %4449 = vpow2.f32 %v3244_v8 }
 0x666   : > { %4451 = vpow2.f32 %v3248_v9 }
 0x667   : > { %4453 = vpow2.f32 %v3246_v10 }
 0x668   : > { %4455 = vpow2.f32 %v3250_v11 }
 0x66b   : > { %v4442_v12 = vpop.eup %4441 }
 0x66c   : > { %v4444_v13 = vpop.eup %4443  ;;  %v3258_v14 = vadd.f32 1.0, %v4442_v12  ;;  %v2453_v12 = vsub.s32 4, %v5181_v31 }
 0x66d   : > { %v4446_v15 = vpop.eup %4445  ;;  %v3260_v16 = vadd.f32 1.0, %v4444_v13  ;;  %v2457_v13 = vsub.s32 5, %v5181_v31 }
 0x66e   : > { %v4448_v17 = vpop.eup %4447  ;;  %4457 = vrcp.f32 %v3258_v14  ;;  %v3259_v18 = vadd.f32 1.0, %v4446_v15  ;;  %v2454_v14 = vrot.slane %v5759_v40, %v2453_v12 }
 0x66f   : > { %v4450_v19 = vpop.eup %4449  ;;  %4459 = vrcp.f32 %v3260_v16  ;;  %v3261_v20 = vadd.f32 1.0, %v4448_v17  ;;  %v2458_v15 = vrot.slane %v5759_v40, %v2457_v13 }
 0x670   : > { %v4452_v21 = vpop.eup %4451  ;;  %4461 = vrcp.f32 %v3259_v18  ;;  %v3265_v22 = vadd.f32 1.0, %v4450_v19 }
 0x671   : > { %v4454_v23 = vpop.eup %4453  ;;  %4463 = vrcp.f32 %v3261_v20  ;;  %v3267_v24 = vadd.f32 1.0, %v4452_v21 }
 0x672   : > { %v4456_v25 = vpop.eup %4455  ;;  %4465 = vrcp.f32 %v3265_v22  ;;  %v3266_v26 = vadd.f32 1.0, %v4454_v23 }
 0x673   : > { %4467 = vrcp.f32 %v3267_v24  ;;  %v3268_v27 = vadd.f32 1.0, %v4456_v25 }
 0x674   : > { %4469 = vrcp.f32 %v3266_v26 }
 0x675   : > { %4471 = vrcp.f32 %v3268_v27 }
 0x678   : > { %v4458_v29 = vpop.eup %4457 }
 0x679   : > { %v4460_v30 = vpop.eup %4459  ;;  %v3286_v33 = vmax.f32 %v4458_v29, 0.0 }
 0x67a   : > { %v4462_v35 = vpop.eup %4461  ;;  %v3288_v36 = vmax.f32 %v4460_v30, 0.0  ;;  %v3874_v37 = vpop.f32.mrb[24].mxu1 }
 0x67b   : > { %v4464_v39 = vpop.eup %4463  ;;  %v3300_v41 = vmin.f32 %v3286_v33, 1.0  ;;  %v3287_v42 = vmax.f32 %v4462_v35, 0.0  ;;  %v3875_v43 = vpop.f32.mrb[25].mxu1 }
 0x67c   : > { %v4466_v45 = vpop.eup %4465  ;;  %v3302_v46 = vmin.f32 %v3288_v36, 1.0  ;;  %v3289_v47 = vmax.f32 %v4464_v39, 0.0  ;;  %v3876_v48 = vadd.f32 %v3875_v43, %v3874_v37  ;;  %v3877_v49 = vpop.f32.mrb[26].mxu1 }
 0x67d   : > { %v4468_v50 = vpop.eup %4467  ;;  %v3301_v51 = vmin.f32 %v3287_v42, 1.0  ;;  %v3293_v52 = vmax.f32 %v4466_v45, 0.0  ;;  %v3878_v53 = vpop.f32.mrb[27].mxu1 }
 0x67e   : > { %v4470_v44 = vpop.eup %4469  ;;  %v3303_v54 = vmin.f32 %v3289_v47, 1.0  ;;  %v3295_v55 = vmax.f32 %v4468_v50, 0.0  ;;  %v3210_v56 = vadd.f32 %v3876_v48, %v2462_v38  ;;  %v3879_v57 = vadd.f32 %v3878_v53, %v3877_v49 }
 0x67f   : > { %v4472_v32 = vpop.eup %4471  ;;  %v3850_v58 = vpack.c.bf16 %v3301_v51, %v3300_v41  ;;  %v3307_v59 = vmin.f32 %v3293_v52, 1.0  ;;  %v3294_v60 = vmax.f32 %v4470_v44, 0.0 }
 0x680   : > { %v3851_v61 = vpack.c.bf16 %v3303_v54, %v3302_v46  ;;  %v3309_v34 = vmin.f32 %v3295_v55, 1.0  ;;  %v3296_v62 = vmax.f32 %v4472_v32, 0.0  ;;  %v3222_v63 = vsub.f32 0.0, %v3210_v56 }
 0x681   : > { %3358 = vst [vmem:[%s5773_s26] sm:$0xff] %v3850_v58  ;;  %v3308_v0 = vmin.f32 %v3294_v60, 1.0  ;;  %v3213_v1 = vadd.f32 %v3879_v57, %v2462_v38 }
 0x682   : > { %3359 = vst [vmem:[%s5773_s26 + $0x8] sm:$0xff] %v3851_v61  ;;  %v3310_v2 = vmin.f32 %v3296_v62, 1.0  ;;  %v3242_v3 = vmul.f32 1.442695, %v3222_v63 }
 0x683   : > { %v3854_v4 = vpack.c.bf16 %v3308_v0, %v3307_v59  ;;  %v3229_v5 = vsub.f32 0.0, %v3213_v1 }
 0x684   : > { %v3855_v6 = vpack.c.bf16 %v3310_v2, %v3309_v34  ;;  %4473 = vpow2.f32 %v3242_v3 }
 0x685   : > { %3363 = vst [vmem:[%s5773_s26 + $0x1c] sm:$0xff] %v3854_v4  ;;  %v3256_v7 = vmul.f32 1.442695, %v3229_v5 }
 0x686   : > { %3364 = vst [vmem:[%s5773_s26 + $0x24] sm:$0xff] %v3855_v6 }
 0x687   : > { %4475 = vpow2.f32 %v3256_v7 }
 0x68e   : > { %v4474_v8 = vpop.eup %4473 }
 0x68f   : > { %v3264_v9 = vadd.f32 1.0, %v4474_v8 }
 0x691   : > { %v4476_v10 = vpop.eup %4475  ;;  %4477 = vrcp.f32 %v3264_v9 }
 0x692   : > { %v3271_v11 = vadd.f32 1.0, %v4476_v10 }
 0x694   : > { %4479 = vrcp.f32 %v3271_v11 }
 0x69a   : > { %v3166_v16 = vpop.f32.mrb[8].mxu0 }
 0x69b   : > { %v4478_v17 = vpop.eup %4477  ;;  %v3167_v18 = vadd.f32 %v3166_v16, %v2454_v14  ;;  %v3168_v19 = vpop.f32.mrb[9].mxu0 }
 0x69c   : > { %v3292_v20 = vmax.f32 %v4478_v17, 0.0  ;;  %v3169_v21 = vadd.f32 %v3168_v19, %v2458_v15  ;;  %v3170_v22 = vpop.f32.mrb[10].mxu0 }
 0x69d   : > { %v3220_v23 = vsub.f32 0.0, %v3167_v18  ;;  %v3171_v24 = vadd.f32 %v3170_v22, %v2454_v14  ;;  %v3172_v25 = vpop.f32.mrb[11].mxu0 }
 0x69e   : > { %v4480_v26 = vpop.eup %4479  ;;  %v3306_v27 = vmin.f32 %v3292_v20, 1.0  ;;  %v3221_v28 = vsub.f32 0.0, %v3169_v21  ;;  %v3173_v29 = vadd.f32 %v3172_v25, %v2458_v15 }
 0x69f   : > { %v3299_v31 = vmax.f32 %v4480_v26, 0.0  ;;  %v3238_v30 = vmul.f32 1.442695, %v3220_v23  ;;  %v3227_v40 = vsub.f32 0.0, %v3171_v24 }
 0x6a0   : > { %v3853_v33 = vpack.c.bf16 %v3306_v27, %v3306_v27  ;;  %v3240_v35 = vmul.f32 1.442695, %v3221_v28  ;;  %v3228_v36 = vsub.f32 0.0, %v3173_v29 }
 0x6a1   : > { %v3313_v37 = vmin.f32 %v3299_v31, 1.0  ;;  %4481 = vpow2.f32 %v3238_v30  ;;  %v3252_v38 = vmul.f32 1.442695, %v3227_v40 }
 0x6a2   : > { %3362 = vst.msk [vmem:[%s5773_s26 + $0x18] sm:$0xf] %vm3361_vm5, %v3853_v33  ;;  %4483 = vpow2.f32 %v3240_v35  ;;  %v3254_v39 = vmul.f32 1.442695, %v3228_v36 }
 0x6a3   : > { %v3857_v41 = vpack.c.bf16 %v3313_v37, %v3313_v37  ;;  %4485 = vpow2.f32 %v3252_v38 }
 0x6a4   : > { %4487 = vpow2.f32 %v3254_v39 }
 0x6a5   : > { %3366 = vst.msk [vmem:[%s5773_s26 + $0x34] sm:$0xf] %vm3361_vm5, %v3857_v41 }
 0x6ab   : > { %v4482_v42 = vpop.eup %4481 }
 0x6ac   : > { %v4484_v43 = vpop.eup %4483  ;;  %v3262_v45 = vadd.f32 1.0, %v4482_v42 }
 0x6ad   : > { %v4486_v46 = vpop.eup %4485  ;;  %v3263_v47 = vadd.f32 1.0, %v4484_v43 }
 0x6ae   : > { %v4488_v48 = vpop.eup %4487  ;;  %4489 = vrcp.f32 %v3262_v45  ;;  %v3269_v49 = vadd.f32 1.0, %v4486_v46 }
 0x6af   : > { %4491 = vrcp.f32 %v3263_v47  ;;  %v3270_v50 = vadd.f32 1.0, %v4488_v48 }
 0x6b0   : > { %4493 = vrcp.f32 %v3269_v49 }
 0x6b1   : > { %4495 = vrcp.f32 %v3270_v50 }
 0x6b8   : > { %v4490_v51 = vpop.eup %4489 }
 0x6b9   : > { %v4492_v52 = vpop.eup %4491  ;;  %v3290_v53 = vmax.f32 %v4490_v51, 0.0 }
 0x6ba   : > { %v4494_v44 = vpop.eup %4493  ;;  %v3291_v54 = vmax.f32 %v4492_v52, 0.0 }
 0x6bb   : > { %v4496_v55 = vpop.eup %4495  ;;  %v3304_v56 = vmin.f32 %v3290_v53, 1.0  ;;  %v3297_v57 = vmax.f32 %v4494_v44, 0.0 }
 0x6bc   : > { %v3305_v32 = vmin.f32 %v3291_v54, 1.0  ;;  %v3298_v58 = vmax.f32 %v4496_v55, 0.0 }
 0x6bd   : > { %v3311_v59 = vmin.f32 %v3297_v57, 1.0 }
 0x6be   : > { %v3852_v60 = vpack.c.bf16 %v3305_v32, %v3304_v56  ;;  %v3312_v61 = vmin.f32 %v3298_v58, 1.0 }
 0x6c0   : > { %3360 = vst [vmem:[%s5773_s26 + $0x10] sm:$0xff] %v3852_v60  ;;  %v3856_v34 = vpack.c.bf16 %v3312_v61, %v3311_v59 }
 0x6c2   : > { %3365 = vst [vmem:[%s5773_s26 + $0x2c] sm:$0xff] %v3856_v34 }
 0x6c3   : > { %4538 = shalt.err (!%p4535_p7)
}
 0x6c4   : > { %s4539_s20 = scalar_lea.hbm %s5795_s27, 896  ;;  %s4543_s18 = scalar_lea.hbm %s5855_s14, 1792 }
 0x6c5   : > { %p4540_p8 = scmp.ne.s32.totalorder %s5795_s27, %s4539_s20  ;;  %p4544_p1 = scmp.lt.u32.totalorder %s5795_s27, %s5855_s14 }
 0x6c6   : > { %p4545_p0 = scmp.lt.u32.totalorder %s4543_s18, %s4539_s20  ;;  %p4547_p6 = scmp.lt.u32.totalorder %s4539_s20, %s5795_s27 }
 0x6c7   : > { %p4541_p11 = pnand %p4540_p8, %p5879_p9 }
 0x6c8   : > { %p4546_p5 = por %p4545_p0, %p4544_p1 }
 0x6c9   : > { %p4542_p13 = pneg %p4541_p11 }
 0x6ca   : > { %p4548_p10 = por %p4547_p6, %p4546_p5 }
 0x6cc   : > { %p4549_p12 = pnand %p4548_p10, %p4542_p13 }
 0x6ce   : > { %4552 = shalt.err (!%p4549_p12)
}
 0x6cf   : > { %s4598_s22 = smov 448   ;;  %s4599_s23 = smov 28  }
 0x6d0   : > { %3903 = dma.vmem_to_hbm [thread:$0]  (%p5879_p9), %s5789_s8, 896, %s5795_s27, %s5800_s29, %s4598_s22, %s4598_s22, %s4599_s23  }
 0x6d1 PF: > { %s5880_s16 = sld [smem:[#allocation8_spill]]  ;;  %s5881_s30 = sld [smem:[#allocation12_spill]] }
 0x6d2   : > { %p3915_p2 = scmp.ge.s32.totalorder %s4591_s21, 2 }
 0x6d7   : > { %s3406_s17 = sand.u32 1, %s5880_s16   ;;  %p5882_p3 = scmp.ne.s32.totalorder %s5881_s30, 0 }
 0x6d8   : > { %s3407_s20 = scalar_lea.sflag [#allocation4], %s3406_s17 }
 0x6d9   : > { %p3910_p4 = pnand %p3915_p2, %p5882_p3 }
 0x6db   : > { %4574 = dma.done.wait (!%p3910_p4), %s3407_s20, 896  }
 0x6dc   : > { %4576 = vsyncadd (!%p3910_p4), %s3407_s20, 4294966400  ;;  %s5883_s21 = sld [smem:[#allocation10_spill]]  ;;  %s5884_s26 = sld [smem:[#allocation9_spill]] }
 0x6dd   : > { %s5885_s20 = sld [smem:[#allocation11_spill]]  ;;  %s5886_s18 = smov %s4583_s19 }
 0x6e2   : > { %p27_p7 = scmp.ge.s32.totalorder %s5883_s21, 4   ;;  %s5887_s19 = smov %s5884_s26 }
 0x6e4   :  { %29 = sbr.rel (!%p27_p7) target bundleno = 6 (0x6), region = 131 }
 0x6eb   :  { %3420 = vsyncpa [#allocation3], 1 }
 0x6ec   :  { %3422 = vsyncpa [#allocation3 + $0x1], 1 }
 0x6ed   :  { %3423 = vsyncpa [#allocation4], 1 }
 0x6ee   :  { %3425 = vsyncpa [#allocation4 + $0x1], 1 }

</bundles_post_ra>
